<compile_context>
chip_gen: v7x
topology: tpu7x:2x2x1
jax: 0.10.0
libtpu: 0.0.40
codegen_flags: <defaults>
</compile_context>

<pallas_src>
import jax
import jax.numpy as jnp
from jax import lax
from jax.experimental import pallas as pl
from jax.experimental.pallas import tpu as pltpu  # noqa: F401  (TPU backend)

EPS = 1e-5


def _bn_train_kernel(x_ref, gamma_ref, beta_ref, o_ref):
    # x_ref:               (N, C, HW)  -- channels on sublanes, spatial on lanes
    # gamma_ref, beta_ref: (1, C, 1)
    x = x_ref[...].astype(jnp.float32)
    n_elems = x.shape[0] * x.shape[2]
    inv_n = jnp.float32(1.0 / n_elems)

    # One-pass per-channel statistics: lane-reduce + batch-reduce (XLU work,
    # off the VALU critical path).
    s = jnp.sum(x, axis=(0, 2), keepdims=True)        # (1, C, 1)  sum(x)
    ss = jnp.sum(x * x, axis=(0, 2), keepdims=True)   # (1, C, 1)  sum(x^2)

    mean = s * inv_n                                   # (1, C, 1)
    var = jnp.maximum(ss * inv_n - mean * mean, 0.0)   # biased variance
    inv_std = lax.rsqrt(var + EPS)                     # EUP

    # Fold affine parameters so the big tensor sees exactly one FMA.
    scale = gamma_ref[...].astype(jnp.float32) * inv_std          # (1, C, 1)
    bias = beta_ref[...].astype(jnp.float32) - mean * scale       # (1, C, 1)

    o_ref[...] = (x * scale + bias).astype(o_ref.dtype)


def batchnorm2d_train(x_nchw, gamma, beta):
    """Training-mode BatchNorm2d forward. x_nchw: (N, C, H, W)."""
    N, C, H, W = x_nchw.shape
    HW = H * W
    x3 = x_nchw.reshape(N, C, HW)        # free reshape (channel-major kept)
    gamma3 = gamma.reshape(1, C, 1)
    beta3 = beta.reshape(1, C, 1)

    out3 = pl.pallas_call(
        _bn_train_kernel,
        out_shape=jax.ShapeDtypeStruct((N, C, HW), x_nchw.dtype),
        in_specs=[
            pl.BlockSpec((N, C, HW), lambda: (0, 0, 0)),
            pl.BlockSpec((1, C, 1), lambda: (0, 0, 0)),
            pl.BlockSpec((1, C, 1), lambda: (0, 0, 0)),
        ],
        out_specs=pl.BlockSpec((N, C, HW), lambda: (0, 0, 0)),
    )(x3, gamma3, beta3)

    return out3.reshape(N, C, H, W)      # free reshape back to NCHW


if __name__ == "__main__":
    # Shapes consistent with the module: x54 is (1, 168, 28, 28)
    N, C, H, W = 1, 168, 28, 28
    key = jax.random.PRNGKey(0)
    kx, kg, kb = jax.random.split(key, 3)
    x = jax.random.normal(kx, (N, C, H, W), dtype=jnp.float32)

    # Non-trivial affine parameters to exercise the fused scale/bias path.
    gamma = 1.0 + 0.1 * jax.random.normal(kg, (C,), dtype=jnp.float32)
    beta = 0.1 * jax.random.normal(kb, (C,), dtype=jnp.float32)

    out = batchnorm2d_train(x, gamma, beta)
    jax.block_until_ready(out)

    # Pure-JAX reference (training-mode batch statistics, biased variance).
    mean_ref = jnp.mean(x, axis=(0, 2, 3), keepdims=True)
    var_ref = jnp.mean((x - mean_ref) ** 2, axis=(0, 2, 3), keepdims=True)
    ref = (x - mean_ref) / jnp.sqrt(var_ref + EPS) * gamma.reshape(1, C, 1, 1) \
          + beta.reshape(1, C, 1, 1)

    assert out.shape == (N, C, H, W)
    assert jnp.max(jnp.abs(out - ref)) < 1e-4

    # TODO(synk): running_mean / running_var updates (PyTorch training-mode
    # side effect) are not produced; the module's forward output does not
    # depend on them.

    print("KERNEL_OK")
</pallas_src>

<mosaic_0001>
module attributes {stable_mosaic.version = 11 : i64} {
  func.func @_bn_train_kernel(%arg0: memref<1x168x784xf32, #tpu.memory_space<vmem>>, %arg1: memref<1x168x1xf32, #tpu.memory_space<vmem>>, %arg2: memref<1x168x1xf32, #tpu.memory_space<vmem>>, %arg3: memref<1x168x784xf32, #tpu.memory_space<vmem>>) attributes {dimension_semantics = [], scalar_prefetch = 0 : i64, scratch_operands = 0 : i64, tpu.core_type = #tpu.core_type<tc>} {
    %c0 = arith.constant 0 : index
    %c0_0 = arith.constant 0 : index
    %c0_1 = arith.constant 0 : index
    %0 = vector.load %arg0[%c0, %c0_0, %c0_1] : memref<1x168x784xf32, #tpu.memory_space<vmem>>, vector<1x168x784xf32>
    %cst = arith.constant dense<0.000000e+00> : vector<168xf32>
    %1 = vector.multi_reduction <add>, %0, %cst [0, 2] : vector<1x168x784xf32> to vector<168xf32>
    %2 = vector.shape_cast %1 : vector<168xf32> to vector<1x168x1xf32>
    %3 = arith.mulf %0, %0 : vector<1x168x784xf32>
    %cst_2 = arith.constant dense<0.000000e+00> : vector<168xf32>
    %4 = vector.multi_reduction <add>, %3, %cst_2 [0, 2] : vector<1x168x784xf32> to vector<168xf32>
    %5 = vector.shape_cast %4 : vector<168xf32> to vector<1x168x1xf32>
    %cst_3 = arith.constant 0.00127551018 : f32
    %6 = vector.broadcast %cst_3 : f32 to vector<1x168x1xf32>
    %7 = arith.mulf %2, %6 : vector<1x168x1xf32>
    %cst_4 = arith.constant 0.00127551018 : f32
    %8 = vector.broadcast %cst_4 : f32 to vector<1x168x1xf32>
    %9 = arith.mulf %5, %8 : vector<1x168x1xf32>
    %10 = arith.mulf %7, %7 : vector<1x168x1xf32>
    %11 = arith.subf %9, %10 : vector<1x168x1xf32>
    %cst_5 = arith.constant 0.000000e+00 : f32
    %12 = vector.broadcast %cst_5 : f32 to vector<1x168x1xf32>
    %13 = arith.maximumf %11, %12 : vector<1x168x1xf32>
    %cst_6 = arith.constant 9.99999974E-6 : f32
    %14 = vector.broadcast %cst_6 : f32 to vector<1x168x1xf32>
    %15 = arith.addf %13, %14 : vector<1x168x1xf32>
    %16 = math.rsqrt %15 : vector<1x168x1xf32>
    %c0_7 = arith.constant 0 : index
    %c0_8 = arith.constant 0 : index
    %c0_9 = arith.constant 0 : index
    %17 = vector.load %arg1[%c0_7, %c0_8, %c0_9] : memref<1x168x1xf32, #tpu.memory_space<vmem>>, vector<1x168x1xf32>
    %18 = arith.mulf %17, %16 : vector<1x168x1xf32>
    %c0_10 = arith.constant 0 : index
    %c0_11 = arith.constant 0 : index
    %c0_12 = arith.constant 0 : index
    %19 = vector.load %arg2[%c0_10, %c0_11, %c0_12] : memref<1x168x1xf32, #tpu.memory_space<vmem>>, vector<1x168x1xf32>
    %20 = arith.mulf %7, %18 : vector<1x168x1xf32>
    %21 = arith.subf %19, %20 : vector<1x168x1xf32>
    %22 = vector.broadcast %18 : vector<1x168x1xf32> to vector<1x168x784xf32>
    %23 = arith.mulf %0, %22 : vector<1x168x784xf32>
    %24 = vector.broadcast %21 : vector<1x168x1xf32> to vector<1x168x784xf32>
    %25 = arith.addf %23, %24 : vector<1x168x784xf32>
    %c0_13 = arith.constant 0 : index
    %c0_14 = arith.constant 0 : index
    %c0_15 = arith.constant 0 : index
    %26 = vector.load %arg3[%c0_13, %c0_14, %c0_15] : memref<1x168x784xf32, #tpu.memory_space<vmem>>, vector<1x168x784xf32>
    tpu.vector_store %arg3[%c0_13, %c0_14, %c0_15], %25 {strides = array<i32>} : memref<1x168x784xf32, #tpu.memory_space<vmem>>, vector<1x168x784xf32>,
    return
  }
}

</mosaic_0001>

<bundles_post_ra>
// kernel: tpu_custom_call.1
= control target key start
LH: loop header
LB: loop body
LE: loop exit
PB: predicated region body
PF: predicated region fallthrough
CT: control target
= control target key end

     0   :  { %8 = vsyncpa [#allocation3], 0  ;;  %s3588_s0 = inlined_call_operand.hbm [shape: f32[1,168,784], index: 0, kind: input, shape index: {}]   ;;  %s3589_s1 = inlined_call_operand.vmem [shape: f32[1,168,1], index: 1, kind: input, shape index: {}]   ;;  %s3590_s2 = inlined_call_operand.vmem [shape: f32[1,168,1], index: 2, kind: input, shape index: {}]   ;;  %s3591_s3 = inlined_call_operand.hbm [shape: f32[1,168,784], index: 3, kind: output, shape index: {}]  }
   0x1   :  { %9 = vsyncpa [#allocation4], 0  ;;  %s1866_s12 = smov [#allocation2]   ;;  %s1818_s16 = scalar_lea.hbm %s3588_s0, 18816 }
   0x2   :  { %s15_s13 = sshll.u32 %s1866_s12, 4  ;;  %p1819_p0 = scmp.ne.s32.totalorder %s3588_s0, %s1818_s16  ;;  %s16_s13 = int_to_ptr.vmem [resolvable:$true] %s15_s13 }
   0x3   :  { %p1822_p1 = scmp.lt.u32.totalorder %s1818_s16, %s3588_s0 }
   0x5   :  { %p1824_p2 = pnand %p1822_p1, %p1819_p0 }
   0x7   :  { %1827 = shalt.err (!%p1824_p2)
}
   0x8   :  { %s1828_s21 = scalar_lea.vmem %s16_s13, 18816  ;;  %p1833_p4 = scmp.lt.s32.totalorder %s16_s13, %s16_s13 }
   0x9   :  { %p1829_p3 = scmp.ne.s32.totalorder %s16_s13, %s1828_s21  ;;  %p1834_p5 = scmp.lt.s32.totalorder %s1828_s21, %s1828_s21 }
   0xb   :  { %p1835_p6 = por %p1834_p5, %p1833_p4 }
   0xd   :  { %p1836_p7 = pnand %p1835_p6, %p1829_p3 }
   0xf   :  { %1839 = shalt.err (!%p1836_p7)
}
  0x10   :  { %s1867_s22 = smov 896   ;;  %s1868_s23 = smov 56  }
  0x11   :  { %21 = dma.hbm_to_vmem [thread:$0]  %s3588_s0, 18816, %s16_s13, [#allocation3], %s1867_s22, %s1867_s22, %s1868_s23  }
  0x12   :  { %1862 = dma.done.wait [#allocation3], 18816  }
  0x13   :  { %1863 = vsyncadd [#allocation3], 4294948480  ;;  %v43_v0 = vld [vmem:[#allocation2 + $0x70] sm:$0xff]  ;;  %v44_v1 = vld [vmem:[#allocation2 + $0x78] sm:$0xff]  ;;  %vm181_vm0 = vcmask 130048  }
  0x14   :  { %v45_v2 = vld [vmem:[#allocation2 + $0x80] sm:$0xff]  ;;  %v46_v3 = vld [vmem:[#allocation2 + $0x88] sm:$0xff]  ;;  %v195_v4 = vadd.f32 %v44_v1, %v43_v0  ;;  %v380_v8 = vmul.f32 %v43_v0, %v43_v0  ;;  %v381_v9 = vmul.f32 %v44_v1, %v44_v1  ;;  %v47_v11 = vld [vmem:[#allocation2 + $0x90] sm:$0xff] }
  0x15   :  { %v49_v5 = vld [vmem:[#allocation2 + $0xa0] sm:$0xff]  ;;  %v30_v7 = vld [vmem:[#allocation2 + $0x8] sm:$0xff]  ;;  %v382_v10 = vmul.f32 %v45_v2, %v45_v2  ;;  %v48_v12 = vld [vmem:[#allocation2 + $0x98] sm:$0xff]  ;;  %v383_v17 = vmul.f32 %v46_v3, %v46_v3  ;;  %v1908_v23 = vmul.f32 %v47_v11, %v47_v11 }
  0x16   :  { %v29_v6 = vld [vmem:[#allocation2] sm:$0xff]  ;;  %v196_v13 = vadd.f32 %v195_v4, %v45_v2  ;;  %v31_v14 = vld [vmem:[#allocation2 + $0x10] sm:$0xff]  ;;  %v32_v18 = vld [vmem:[#allocation2 + $0x18] sm:$0xff]  ;;  %v367_v21 = vmul.f32 %v30_v7, %v30_v7  ;;  %v1910_v24 = vmul.f32 %v48_v12, %v48_v12  ;;  %v200_v26 = vsel %vm181_vm0, %v49_v5, 0.0 }
  0x17   :  { %v176_v15 = vadd.f32 %v30_v7, %v29_v6  ;;  %v366_v16 = vmul.f32 %v29_v6, %v29_v6  ;;  %v35_v19 = vld [vmem:[#allocation2 + $0x30] sm:$0xff]  ;;  %v1906_v20 = vld [vmem:[#allocation2 + $0xa8] sm:$0xff]  ;;  %v368_v22 = vmul.f32 %v31_v14, %v31_v14  ;;  %v33_v27 = vld [vmem:[#allocation2 + $0x20] sm:$0xff]  ;;  %v369_v31 = vmul.f32 %v32_v18, %v32_v18 }
  0x18   :  { %v197_v25 = vadd.f32 %v196_v13, %v46_v3  ;;  %v1913_v29 = vld [vmem:[#allocation2 + $0xb0] sm:$0xff]  ;;  %v1915_v30 = vld [vmem:[#allocation2 + $0xb8] sm:$0xff]  ;;  %v34_v32 = vld [vmem:[#allocation2 + $0x28] sm:$0xff]  ;;  %v182_v33 = vsel %vm181_vm0, %v35_v19, 0.0  ;;  %v370_v37 = vmul.f32 %v33_v27, %v33_v27  ;;  %v531_v45 = vadd.f32 %v381_v9, %v380_v8 }
  0x19   :  { %v177_v28 = vadd.f32 %v176_v15, %v31_v14  ;;  %v1918_v34 = vld [vmem:[#allocation2 + $0xc0] sm:$0xff]  ;;  %v1920_v35 = vld [vmem:[#allocation2 + $0xd8] sm:$0xff]  ;;  %v204_v36 = vadd.f32 %v1913_v29, %v1906_v20  ;;  %v513_v38 = vadd.f32 %v367_v21, %v366_v16  ;;  %v1928_v43 = vld [vmem:[#allocation2 + $0x48] sm:$0xff]  ;;  %v371_v44 = vmul.f32 %v34_v32, %v34_v32 }
  0x1a   :  { %v198_v39 = vadd.f32 %v197_v25, %v47_v11  ;;  %v1924_v41 = vld [vmem:[#allocation2 + $0x38] sm:$0xff]  ;;  %v1926_v42 = vld [vmem:[#allocation2 + $0x40] sm:$0xff]  ;;  %v1930_v46 = vld [vmem:[#allocation2 + $0xc8] sm:$0xff]  ;;  %v372_v49 = vmul.f32 %v35_v19, %v35_v19  ;;  %v386_v56 = vmul.f32 %v49_v5, %v49_v5  ;;  %v532_v57 = vadd.f32 %v531_v45, %v382_v10 }
  0x1b   :  { %v178_v40 = vadd.f32 %v177_v28, %v32_v18  ;;  %v205_v47 = vadd.f32 %v204_v36, %v1915_v30  ;;  %v186_v48 = vadd.f32 %v1926_v42, %v1924_v41  ;;  %v514_v50 = vadd.f32 %v513_v38, %v368_v22  ;;  %v1935_v53 = vld [vmem:[#allocation2 + $0x50] sm:$0xff]  ;;  %v1937_v54 = vld [vmem:[#allocation2 + $0x118] sm:$0xff]  ;;  %v1939_v55 = vld [vmem:[#allocation2 + $0x120] sm:$0xff] }
  0x1c   :  { %v199_v51 = vadd.f32 %v198_v39, %v48_v12  ;;  %v1941_v58 = vld [vmem:[#allocation2 + $0xd0] sm:$0xff]  ;;  %v209_v60 = vsel %vm181_vm0, %v1920_v35, 0.0  ;;  %v1946_v61 = vld [vmem:[#allocation2 + $0x58] sm:$0xff]  ;;  %v1949_v63 = vld [vmem:[#allocation2 + $0x128] sm:$0xff]  ;;  %v222_v0 = vadd.f32 %v1939_v55, %v1937_v54  ;;  %v533_v8 = vadd.f32 %v532_v57, %v383_v17 }
  0x1d   :  { %v179_v52 = vadd.f32 %v178_v40, %v33_v27  ;;  %v206_v59 = vadd.f32 %v205_v47, %v1918_v34  ;;  %v187_v62 = vadd.f32 %v186_v48, %v1928_v43  ;;  %v1953_v3 = vld [vmem:[#allocation2 + $0x60] sm:$0xff]  ;;  %v1955_v4 = vld [vmem:[#allocation2 + $0x68] sm:$0xff]  ;;  %v1957_v5 = vld [vmem:[#allocation2 + $0x130] sm:$0xff]  ;;  %v515_v7 = vadd.f32 %v514_v50, %v369_v31 }
  0x1e   :  { %v201_v1 = vadd.f32 %v200_v26, %v199_v51  ;;  %v1959_v6 = vld [vmem:[#allocation2 + $0xe0] sm:$0xff]  ;;  %v1963_v11 = vld [vmem:[#allocation2 + $0x138] sm:$0xff]  ;;  %v223_v12 = vadd.f32 %v222_v0, %v1949_v63  ;;  %v1966_v13 = vld [vmem:[#allocation2 + $0xe8] sm:$0xff]  ;;  %v518_v15 = vsel %vm181_vm0, %v372_v49, 0.0  ;;  %v534_v25 = vadd.f32 %v533_v8, %v1908_v23 }
  0x1f   :  { %v180_v2 = vadd.f32 %v179_v52, %v34_v32  ;;  %v207_v9 = vadd.f32 %v206_v59, %v1930_v46  ;;  %v188_v10 = vadd.f32 %v187_v62, %v1935_v53  ;;  %3668 = vst [vmem:[#allocation8_spill] sm:$0xff] %v1963_v11  ;;  %v1968_v14 = vld [vmem:[#allocation2 + $0xf0] sm:$0xff]  ;;  %v1971_v18 = vld [vmem:[#allocation2 + $0x140] sm:$0xff]  ;;  %v1973_v19 = vld [vmem:[#allocation2 + $0x148] sm:$0xff]  ;;  %v213_v21 = vadd.f32 %v1966_v13, %v1959_v6 }
  0x20   :  { %202 = vadd.xlane.f32.xlu1 %v201_v1  ;;  %3669 = vst [vmem:[#allocation9_spill] sm:$0xff] %v1971_v18  ;;  %v1975_v17 = vld [vmem:[#allocation2 + $0xf8] sm:$0xff]  ;;  %v516_v22 = vadd.f32 %v515_v7, %v370_v37  ;;  %v224_v28 = vadd.f32 %v223_v12, %v1957_v5  ;;  %v1983_v31 = vld [vmem:[#allocation2 + $0x188] sm:$0xff]  ;;  %v1985_v32 = vld [vmem:[#allocation2 + $0x190] sm:$0xff]  ;;  %v536_v36 = vsel %vm181_vm0, %v386_v56, 0.0  ;;  %v191_v37 = vsel %vm181_vm0, %v1955_v4, 0.0 }
  0x21   :  { %v183_v16 = vadd.f32 %v182_v33, %v180_v2  ;;  %v208_v26 = vadd.f32 %v207_v9, %v1941_v58  ;;  %v189_v27 = vadd.f32 %v188_v10, %v1946_v61  ;;  %3670 = vst [vmem:[#allocation10_spill] sm:$0xff] %v1983_v31  ;;  %3671 = vst [vmem:[#allocation11_spill] sm:$0xff] %v1985_v32  ;;  %v1987_v33 = vld [vmem:[#allocation2 + $0x198] sm:$0xff]  ;;  %v1992_v38 = vld [vmem:[#allocation2 + $0x100] sm:$0xff]  ;;  %v227_v59 = vsel %vm181_vm0, %v1973_v19, 0.0 }
  0x22   :  { %3672 = vst [vmem:[#allocation12_spill] sm:$0xff] %v1987_v33  ;;  %v1994_v23 = vld [vmem:[#allocation2 + $0x110] sm:$0xff]  ;;  %v214_v39 = vadd.f32 %v213_v21, %v1968_v14  ;;  %v1997_v40 = vld [vmem:[#allocation2 + $0x1a0] sm:$0xff]  ;;  %v240_v45 = vadd.f32 %v1985_v32, %v1983_v31  ;;  %v517_v47 = vadd.f32 %v516_v22, %v371_v44  ;;  %v225_v50 = vadd.f32 %v224_v28, %v1963_v11  ;;  %v2003_v51 = vld [vmem:[#allocation2 + $0x1b8] sm:$0xff] }
  0x23   :  { %184 = vadd.xlane.f32.xlu0 %v183_v16  ;;  %3673 = vst [vmem:[#allocation13_spill] sm:$0xff] %v1997_v40  ;;  %v210_v48 = vadd.f32 %v209_v60, %v208_v26  ;;  %v190_v49 = vadd.f32 %v189_v27, %v1953_v3  ;;  %3674 = vst [vmem:[#allocation14_spill] sm:$0xff] %v2003_v51  ;;  %v2005_v52 = vld [vmem:[#allocation2 + $0x150] sm:$0xff]  ;;  %v2007_v56 = vld [vmem:[#allocation2 + $0x158] sm:$0xff]  ;;  %v535_v57 = vadd.f32 %v534_v25, %v1910_v24 }
  0x24   :  { %v2012_v62 = vld [vmem:[#allocation2 + $0x108] sm:$0xff]  ;;  %v215_v44 = vadd.f32 %v214_v39, %v1975_v17  ;;  %v241_v0 = vadd.f32 %v240_v45, %v1987_v33  ;;  %v2018_v1 = vld [vmem:[#allocation2 + $0x160] sm:$0xff]  ;;  %v231_v2 = vadd.f32 %v2007_v56, %v2005_v52  ;;  %v226_v24 = vadd.f32 %v225_v50, %v1971_v18  ;;  %v2025_v9 = vld [vmem:[#allocation2 + $0x1b0] sm:$0xff] }
  0x25   :  { %v2015_v60 = vld [vmem:[#allocation2 + $0x1a8] sm:$0xff]  ;;  %211 = vadd.xlane.f32.xlu1 %v210_v48  ;;  %v192_v7 = vadd.f32 %v191_v37, %v190_v49  ;;  %v218_v8 = vsel %vm181_vm0, %v1994_v23, 0.0  ;;  %3676 = vst [vmem:[#allocation16_spill] sm:$0xff] %v2025_v9  ;;  %v2029_v12 = vld [vmem:[#allocation2 + $0x1f8] sm:$0xff]  ;;  %v373_v16 = vmul.f32 %v1924_v41, %v1924_v41  ;;  %v245_v25 = vsel %vm181_vm0, %v2003_v51, 0.0  ;;  %v2037_v26 = vld [vmem:[#allocation2 + $0x180] sm:$0xff] }
  0x26   :  { %3675 = vst [vmem:[#allocation15_spill] sm:$0xff] %v2015_v60  ;;  %v2027_v10 = vld [vmem:[#allocation2 + $0x168] sm:$0xff]  ;;  %3677 = vst [vmem:[#allocation17_spill] sm:$0xff] %v2029_v12  ;;  %v216_v21 = vadd.f32 %v215_v44, %v1992_v38  ;;  %v242_v22 = vadd.f32 %v241_v0, %v1997_v40  ;;  %v232_v27 = vadd.f32 %v231_v2, %v2018_v1  ;;  %v2040_v28 = vld [vmem:[#allocation2 + $0x200] sm:$0xff] }
  0x27   :  { %3678 = vst [vmem:[#allocation18_spill] sm:$0xff] %v2040_v28  ;;  %v2042_v37 = vld [vmem:[#allocation2 + $0x208] sm:$0xff]  ;;  %193 = vadd.xlane.f32.xlu0 %v192_v7  ;;  %v228_v39 = vadd.f32 %v227_v59, %v226_v24  ;;  %v2044_v45 = vld [vmem:[#allocation2 + $0x170] sm:$0xff]  ;;  %v258_v49 = vadd.f32 %v2040_v28, %v2029_v12  ;;  %v2052_v50 = vadd.f32 %v518_v15, %v517_v47  ;;  %v2059_v59 = vld [vmem:[#allocation2 + $0x1c0] sm:$0xff] }
  0x28   :  { %3679 = vst [vmem:[#allocation19_spill] sm:$0xff] %v2042_v37  ;;  %v2046_v41 = vld [vmem:[#allocation2 + $0x210] sm:$0xff]  ;;  %v2048_v48 = vld [vmem:[#allocation2 + $0x228] sm:$0xff]  ;;  %v2054_v44 = vadd.f32 %v536_v36, %v535_v57  ;;  %v217_v0 = vadd.f32 %v216_v21, %v2012_v62  ;;  %v243_v2 = vadd.f32 %v242_v22, %v2015_v60  ;;  %v233_v7 = vadd.f32 %v232_v27, %v2027_v10  ;;  %v2067_v15 = vld [vmem:[#allocation2 + $0x178] sm:$0xff] }
  0x29   :  { %3680 = vst [vmem:[#allocation20_spill] sm:$0xff] %v2046_v41  ;;  %3681 = vst [vmem:[#allocation21_spill] sm:$0xff] %v2048_v48  ;;  %v2061_v24 = vld [vmem:[#allocation2 + $0x1c8] sm:$0xff]  ;;  %v2063_v51 = vld [vmem:[#allocation2 + $0x1d0] sm:$0xff]  ;;  %v374_v40 = vmul.f32 %v1926_v42, %v1926_v42  ;;  %229 = vadd.xlane.f32.xlu1 %v228_v39  ;;  %v236_v36 = vsel %vm181_vm0, %v2037_v26, 0.0  ;;  %v259_v57 = vadd.f32 %v258_v49, %v2042_v37  ;;  %v263_v39 = vsel %vm181_vm0, %v2048_v48, 0.0 }
  0x2a   :  { %3682 = vst [vmem:[#allocation22_spill] sm:$0xff] %v2054_v44  ;;  %v2071_v47 = vld [vmem:[#allocation2 + $0x218] sm:$0xff]  ;;  %v249_v21 = vadd.f32 %v2061_v24, %v2059_v59  ;;  %v375_v22 = vmul.f32 %v1928_v43, %v1928_v43  ;;  %v219_v27 = vadd.f32 %v218_v8, %v217_v0  ;;  %v244_v28 = vadd.f32 %v243_v2, %v2025_v9  ;;  %v2084_v60 = vld [vmem:[#allocation2 + $0x268] sm:$0xff]  ;;  %v2086_v33 = vld [vmem:[#allocation2 + $0x270] sm:$0xff] }
  0x2b   :  { %3683 = vst [vmem:[#allocation23_spill] sm:$0xff] %v2071_v47  ;;  %v234_v42 = vadd.f32 %v233_v7, %v2044_v45  ;;  %v2082_v12 = vld [vmem:[#allocation2 + $0x1d8] sm:$0xff]  ;;  %3684 = vst [vmem:[#allocation24_spill] sm:$0xff] %v2084_v60  ;;  %v2088_v49 = vld [vmem:[#allocation2 + $0x220] sm:$0xff]  ;;  %v260_v37 = vadd.f32 %v259_v57, %v2046_v41  ;;  %v276_v0 = vadd.f32 %v2086_v33, %v2084_v60 }
  0x2c   :  { %3685 = vst [vmem:[#allocation25_spill] sm:$0xff] %v2086_v33  ;;  %3686 = vst [vmem:[#allocation26_spill] sm:$0xff] %v2088_v49  ;;  %v2091_v32 = vld [vmem:[#allocation2 + $0x1e0] sm:$0xff]  ;;  %v250_v43 = vadd.f32 %v249_v21, %v2063_v51  ;;  %v2094_v8 = vld [vmem:[#allocation2 + $0x278] sm:$0xff]  ;;  %v376_v2 = vmul.f32 %v1935_v53, %v1935_v53  ;;  %220 = vadd.xlane.f32.xlu0 %v219_v27  ;;  %v246_v7 = vadd.f32 %v245_v25, %v244_v28 }
  0x2d   :  { %3687 = vst [vmem:[#allocation27_spill] sm:$0xff] %v2091_v32  ;;  %3688 = vst [vmem:[#allocation28_spill] sm:$0xff] %v2094_v8  ;;  %v235_v48 = vadd.f32 %v234_v42, %v2067_v15  ;;  %v2101_v9 = vld [vmem:[#allocation2 + $0x1e8] sm:$0xff]  ;;  %v2103_v31 = vld [vmem:[#allocation2 + $0x1f0] sm:$0xff]  ;;  %v377_v21 = vmul.f32 %v1946_v61, %v1946_v61  ;;  %v522_v44 = vadd.f32 %v374_v40, %v373_v16 }
  0x2e   :  { %3689 = vst [vmem:[#allocation29_spill] sm:$0xff] %v2103_v31  ;;  %v2105_v57 = vld [vmem:[#allocation2 + $0x280] sm:$0xff]  ;;  %v2107_v41 = vld [vmem:[#allocation2 + $0x230] sm:$0xff]  ;;  %v261_v33 = vadd.f32 %v260_v37, %v2071_v47  ;;  %v251_v53 = vadd.f32 %v250_v43, %v2082_v12  ;;  %v2113_v27 = vld [vmem:[#allocation2 + $0x298] sm:$0xff]  ;;  %v277_v25 = vadd.f32 %v276_v0, %v2094_v8  ;;  %v379_v60 = vmul.f32 %v1955_v4, %v1955_v4 }
  0x2f   :  { %3690 = vst [vmem:[#allocation30_spill] sm:$0xff] %v2105_v57  ;;  %3691 = vst [vmem:[#allocation31_spill] sm:$0xff] %v2107_v41  ;;  %v2116_v28 = vld [vmem:[#allocation2 + $0x238] sm:$0xff]  ;;  %v2118_v42 = vld [vmem:[#allocation2 + $0x240] sm:$0xff]  ;;  %247 = vadd.xlane.f32.xlu1 %v246_v7  ;;  %v237_v18 = vadd.f32 %v236_v36, %v235_v48  ;;  %v378_v37 = vmul.f32 %v1953_v3, %v1953_v3  ;;  %v523_v43 = vadd.f32 %v522_v44, %v375_v22 }
  0x30   :  { %3692 = vst [vmem:[#allocation32_spill] sm:$0xff] %v2113_v27  ;;  %3693 = vst [vmem:[#allocation33_spill] sm:$0xff] %v2116_v28  ;;  %v2122_v11 = vld [vmem:[#allocation2 + $0x288] sm:$0xff]  ;;  %v2126_v40 = vld [vmem:[#allocation2 + $0x260] sm:$0xff]  ;;  %v267_v16 = vadd.f32 %v2116_v28, %v2107_v41  ;;  %v262_v0 = vadd.f32 %v261_v33, %v2088_v49  ;;  %v252_v8 = vadd.f32 %v251_v53, %v2091_v32  ;;  %v254_v4 = vsel %vm181_vm0, %v2103_v31, 0.0 }
  0x31   :  { %3694 = vst [vmem:[#allocation34_spill] sm:$0xff] %v2118_v42  ;;  %3695 = vst [vmem:[#allocation35_spill] sm:$0xff] %v2122_v11  ;;  %v2124_v61 = vld [vmem:[#allocation2 + $0x248] sm:$0xff]  ;;  %v278_v48 = vadd.f32 %v277_v25, %v2105_v57  ;;  %v2137_v36 = vld [vmem:[#allocation2 + $0x2d8] sm:$0xff]  ;;  %238 = vadd.xlane.f32.xlu0 %v237_v18  ;;  %v281_v3 = vsel %vm181_vm0, %v2113_v27, 0.0  ;;  %v524_v53 = vadd.f32 %v523_v43, %v376_v2  ;;  %v527_v31 = vsel %vm181_vm0, %v379_v60, 0.0 }
  0x32   :  { %3696 = vst [vmem:[#allocation36_spill] sm:$0xff] %v2124_v61  ;;  %3697 = vst [vmem:[#allocation37_spill] sm:$0xff] %v2126_v40  ;;  %v2139_v7 = vld [vmem:[#allocation2 + $0x2e0] sm:$0xff]  ;;  %v2141_v47 = vld [vmem:[#allocation2 + $0x2e8] sm:$0xff]  ;;  %v268_v44 = vadd.f32 %v267_v16, %v2118_v42  ;;  %v264_v25 = vadd.f32 %v263_v39, %v262_v0  ;;  %v253_v57 = vadd.f32 %v252_v8, %v2101_v9  ;;  %v272_v2 = vsel %vm181_vm0, %v2126_v40, 0.0 }
  0x33   :  { %3698 = vst [vmem:[#allocation38_spill] sm:$0xff] %v2137_v36  ;;  %3699 = vst [vmem:[#allocation39_spill] sm:$0xff] %v2139_v7  ;;  %v2143_v28 = vld [vmem:[#allocation2 + $0x290] sm:$0xff]  ;;  %v294_v22 = vadd.f32 %v2139_v7, %v2137_v36  ;;  %v279_v49 = vadd.f32 %v278_v48, %v2122_v11  ;;  %v2154_v41 = vld [vmem:[#allocation2 + $0x258] sm:$0xff]  ;;  %v525_v40 = vadd.f32 %v524_v53, %v377_v21 }
  0x34   :  { %3700 = vst [vmem:[#allocation40_spill] sm:$0xff] %v2141_v47  ;;  %3701 = vst [vmem:[#allocation41_spill] sm:$0xff] %v2143_v28  ;;  %v2147_v33 = vld [vmem:[#allocation2 + $0x250] sm:$0xff]  ;;  %v2158_v32 = vld [vmem:[#allocation2 + $0x2a0] sm:$0xff]  ;;  %v269_v16 = vadd.f32 %v268_v44, %v2124_v61  ;;  %265 = vadd.xlane.f32.xlu1 %v264_v25  ;;  %v255_v7 = vadd.f32 %v254_v4, %v253_v57  ;;  %v394_v61 = vmul.f32 %v1959_v6, %v1959_v6 }
  0x35   :  { %v2156_v18 = vld [vmem:[#allocation2 + $0x2f0] sm:$0xff]  ;;  %v2160_v27 = vld [vmem:[#allocation2 + $0x2a8] sm:$0xff]  ;;  %v2166_v39 = vld [vmem:[#allocation2 + $0x2f8] sm:$0xff]  ;;  %v295_v43 = vadd.f32 %v294_v22, %v2141_v47  ;;  %v280_v60 = vadd.f32 %v279_v49, %v2143_v28  ;;  %v395_v25 = vmul.f32 %v1966_v13, %v1966_v13 }
  0x36   :  { %3702 = vst [vmem:[#allocation42_spill] sm:$0xff] %v2156_v18  ;;  %3703 = vst [vmem:[#allocation43_spill] sm:$0xff] %v2160_v27  ;;  %v2168_v8 = vld [vmem:[#allocation2 + $0x308] sm:$0xff]  ;;  %v2171_v0 = vld [vmem:[#allocation2 + $0x2b0] sm:$0xff]  ;;  %v285_v48 = vadd.f32 %v2160_v27, %v2158_v32  ;;  %v270_v22 = vadd.f32 %v269_v16, %v2147_v33  ;;  %256 = vadd.xlane.f32.xlu0 %v255_v7 }
  0x37   :  { %3704 = vst [vmem:[#allocation44_spill] sm:$0xff] %v2166_v39  ;;  %3705 = vst [vmem:[#allocation45_spill] sm:$0xff] %v2168_v8  ;;  %v2176_v36 = vld [vmem:[#allocation2 + $0x300] sm:$0xff]  ;;  %v2178_v44 = vld [vmem:[#allocation2 + $0x2b8] sm:$0xff]  ;;  %v296_v47 = vadd.f32 %v295_v43, %v2156_v18  ;;  %v282_v21 = vadd.f32 %v281_v3, %v280_v60  ;;  %v299_v6 = vsel %vm181_vm0, %v2168_v8, 0.0  ;;  %v526_v18 = vadd.f32 %v525_v40, %v378_v37 }
  0x38   :  { %3706 = vst [vmem:[#allocation46_spill] sm:$0xff] %v2171_v0  ;;  %3707 = vst [vmem:[#allocation47_spill] sm:$0xff] %v2176_v36  ;;  %v2180_v11 = vld [vmem:[#allocation2 + $0x348] sm:$0xff]  ;;  %v2186_v42 = vld [vmem:[#allocation2 + $0x2d0] sm:$0xff]  ;;  %v286_v57 = vadd.f32 %v285_v48, %v2171_v0  ;;  %v271_v28 = vadd.f32 %v270_v22, %v2154_v41  ;;  %v396_v8 = vmul.f32 %v1968_v14, %v1968_v14 }
  0x39   :  { %3708 = vst [vmem:[#allocation48_spill] sm:$0xff] %v2178_v44  ;;  %3709 = vst [vmem:[#allocation49_spill] sm:$0xff] %v2180_v11  ;;  %v2189_v4 = vld [vmem:[#allocation2 + $0x350] sm:$0xff]  ;;  %v2191_v49 = vld [vmem:[#allocation2 + $0x358] sm:$0xff]  ;;  %v297_v0 = vadd.f32 %v296_v47, %v2166_v39  ;;  %283 = vadd.xlane.f32.xlu1 %v282_v21  ;;  %v290_v40 = vsel %vm181_vm0, %v2186_v42, 0.0 }
  0x3a   :  { %3710 = vst [vmem:[#allocation50_spill] sm:$0xff] %v2186_v42  ;;  %3711 = vst [vmem:[#allocation51_spill] sm:$0xff] %v2189_v4  ;;  %v2197_v53 = vld [vmem:[#allocation2 + $0x2c0] sm:$0xff]  ;;  %v2201_v43 = vld [vmem:[#allocation2 + $0x378] sm:$0xff]  ;;  %v312_v48 = vadd.f32 %v2189_v4, %v2180_v11  ;;  %v287_v13 = vadd.f32 %v286_v57, %v2178_v44  ;;  %v397_v57 = vmul.f32 %v1975_v17, %v1975_v17 }
  0x3b   :  { %3712 = vst [vmem:[#allocation52_spill] sm:$0xff] %v2191_v49  ;;  %v2199_v16 = vld [vmem:[#allocation2 + $0x360] sm:$0xff]  ;;  %3714 = vst [vmem:[#allocation54_spill] sm:$0xff] %v2201_v43  ;;  %v2208_v7 = vld [vmem:[#allocation2 + $0x310] sm:$0xff]  ;;  %v273_v4 = vadd.f32 %v272_v2, %v271_v28  ;;  %v298_v11 = vadd.f32 %v297_v0, %v2176_v36  ;;  %v317_v21 = vsel %vm181_vm0, %v2201_v43, 0.0  ;;  %v2247_v0 = vadd.f32 %v527_v31, %v526_v18 }
  0x3c   :  { %3713 = vst [vmem:[#allocation53_spill] sm:$0xff] %v2199_v16  ;;  %3715 = vst [vmem:[#allocation55_spill] sm:$0xff] %v2208_v7  ;;  %v2210_v3 = vld [vmem:[#allocation2 + $0x318] sm:$0xff]  ;;  %v2212_v60 = vld [vmem:[#allocation2 + $0x320] sm:$0xff]  ;;  %v313_v47 = vadd.f32 %v312_v48, %v2191_v49  ;;  %v288_v14 = vadd.f32 %v287_v13, %v2197_v53 }
  0x3d   :  { %3716 = vst [vmem:[#allocation56_spill] sm:$0xff] %v2210_v3  ;;  %3717 = vst [vmem:[#allocation57_spill] sm:$0xff] %v2212_v60  ;;  %v2216_v27 = vld [vmem:[#allocation2 + $0x2c8] sm:$0xff]  ;;  %v303_v22 = vadd.f32 %v2210_v3, %v2208_v7  ;;  %v2233_v42 = vld [vmem:[#allocation2 + $0x3b8] sm:$0xff]  ;;  %274 = vadd.xlane.f32.xlu0 %v273_v4  ;;  %v300_v13 = vadd.f32 %v299_v6, %v298_v11 }
  0x3e   :  { %3718 = vst [vmem:[#allocation58_spill] sm:$0xff] %v2216_v27  ;;  %v2220_v37 = vld [vmem:[#allocation2 + $0x368] sm:$0xff]  ;;  %3720 = vst [vmem:[#allocation60_spill] sm:$0xff] %v2233_v42  ;;  %v2235_v44 = vld [vmem:[#allocation2 + $0x3c0] sm:$0xff]  ;;  %v314_v49 = vadd.f32 %v313_v47, %v2199_v16  ;;  %v289_v43 = vadd.f32 %v288_v14, %v2216_v27  ;;  %v400_v14 = vmul.f32 %v1994_v23, %v1994_v23 }
  0x3f   :  { %3719 = vst [vmem:[#allocation59_spill] sm:$0xff] %v2220_v37  ;;  %v2231_v39 = vld [vmem:[#allocation2 + $0x328] sm:$0xff]  ;;  %3721 = vst [vmem:[#allocation61_spill] sm:$0xff] %v2235_v44  ;;  %v2237_v48 = vld [vmem:[#allocation2 + $0x370] sm:$0xff]  ;;  %v304_v17 = vadd.f32 %v303_v22, %v2212_v60  ;;  %v330_v2 = vadd.f32 %v2235_v44, %v2233_v42  ;;  %v398_v22 = vmul.f32 %v1992_v38, %v1992_v38  ;;  %301 = vadd.xlane.f32.xlu1 %v300_v13 }
  0x40   :  { %3722 = vst [vmem:[#allocation62_spill] sm:$0xff] %v2237_v48  ;;  %v2240_v3 = vld [vmem:[#allocation2 + $0x330] sm:$0xff]  ;;  %v2243_v28 = vld [vmem:[#allocation2 + $0x3c8] sm:$0xff]  ;;  %v2250_v36 = vld [vmem:[#allocation2 + $0x338] sm:$0xff]  ;;  %v549_v60 = vadd.f32 %v395_v25, %v394_v61  ;;  %v315_v44 = vadd.f32 %v314_v49, %v2220_v37  ;;  %v291_v42 = vadd.f32 %v290_v40, %v289_v43  ;;  %v399_v25 = vmul.f32 %v2012_v62, %v2012_v62 }
  0x41   :  { %3723 = vst [vmem:[#allocation63_spill] sm:$0xff] %v2240_v3  ;;  %3724 = vst [vmem:[#allocation64_spill] sm:$0xff] %v2243_v28  ;;  %v2252_v7 = vld [vmem:[#allocation2 + $0x340] sm:$0xff]  ;;  %v2254_v47 = vld [vmem:[#allocation2 + $0x3d0] sm:$0xff]  ;;  %v305_v31 = vadd.f32 %v304_v17, %v2231_v39  ;;  %v331_v11 = vadd.f32 %v330_v2, %v2243_v28 }
  0x42   :  { %3725 = vst [vmem:[#allocation65_spill] sm:$0xff] %v2252_v7  ;;  %3726 = vst [vmem:[#allocation66_spill] sm:$0xff] %v2254_v47  ;;  %v2256_v16 = vld [vmem:[#allocation2 + $0x380] sm:$0xff]  ;;  %v2262_v18 = vld [vmem:[#allocation2 + $0x3e8] sm:$0xff]  ;;  %v550_v17 = vadd.f32 %v549_v60, %v396_v8  ;;  %v316_v2 = vadd.f32 %v315_v44, %v2237_v48  ;;  %v308_v23 = vsel %vm181_vm0, %v2252_v7, 0.0  ;;  %292 = vadd.xlane.f32.xlu0 %v291_v42 }
  0x43   :  { %3727 = vst [vmem:[#allocation67_spill] sm:$0xff] %v2256_v16  ;;  %3728 = vst [vmem:[#allocation68_spill] sm:$0xff] %v2262_v18  ;;  %v2265_v4 = vld [vmem:[#allocation2 + $0x388] sm:$0xff]  ;;  %v2267_v6 = vld [vmem:[#allocation2 + $0x390] sm:$0xff]  ;;  %v306_v28 = vadd.f32 %v305_v31, %v2240_v3  ;;  %v332_v43 = vadd.f32 %v331_v11, %v2254_v47  ;;  %v335_v62 = vsel %vm181_vm0, %v2262_v18, 0.0  ;;  %v554_v18 = vsel %vm181_vm0, %v400_v14, 0.0 }
  0x44   :  { %3729 = vst [vmem:[#allocation69_spill] sm:$0xff] %v2265_v4  ;;  %v2271_v27 = vld [vmem:[#allocation2 + $0x3d8] sm:$0xff]  ;;  %v2275_v61 = vld [vmem:[#allocation2 + $0x3b0] sm:$0xff]  ;;  %v321_v49 = vadd.f32 %v2265_v4, %v2256_v16  ;;  %v2286_v40 = vld [vmem:[#allocation2 + $0x428] sm:$0xff]  ;;  %v551_v31 = vadd.f32 %v550_v17, %v397_v57  ;;  %v318_v11 = vadd.f32 %v317_v21, %v316_v2 }
  0x45   :  { %3730 = vst [vmem:[#allocation70_spill] sm:$0xff] %v2271_v27  ;;  %v2273_v38 = vld [vmem:[#allocation2 + $0x398] sm:$0xff]  ;;  %3732 = vst [vmem:[#allocation72_spill] sm:$0xff] %v2275_v61  ;;  %v2288_v13 = vld [vmem:[#allocation2 + $0x430] sm:$0xff]  ;;  %v307_v47 = vadd.f32 %v306_v28, %v2250_v36  ;;  %v333_v48 = vadd.f32 %v332_v43, %v2271_v27  ;;  %v326_v57 = vsel %vm181_vm0, %v2275_v61, 0.0  ;;  %v387_v61 = vmul.f32 %v1906_v20, %v1906_v20 }
  0x46   :  { %3731 = vst [vmem:[#allocation71_spill] sm:$0xff] %v2273_v38  ;;  %3733 = vst [vmem:[#allocation73_spill] sm:$0xff] %v2286_v40  ;;  %v2290_v37 = vld [vmem:[#allocation2 + $0x438] sm:$0xff]  ;;  %v2292_v4 = vld [vmem:[#allocation2 + $0x3e0] sm:$0xff]  ;;  %v322_v44 = vadd.f32 %v321_v49, %v2267_v6  ;;  %v348_v60 = vadd.f32 %v2288_v13, %v2286_v40  ;;  %319 = vadd.xlane.f32.xlu1 %v318_v11  ;;  %v552_v27 = vadd.f32 %v551_v31, %v398_v22 }
  0x47   :  { %3734 = vst [vmem:[#allocation74_spill] sm:$0xff] %v2288_v13  ;;  %3735 = vst [vmem:[#allocation75_spill] sm:$0xff] %v2290_v37  ;;  %v2296_v8 = vld [vmem:[#allocation2 + $0x3a0] sm:$0xff]  ;;  %v2305_v42 = vld [vmem:[#allocation2 + $0x3f0] sm:$0xff]  ;;  %v309_v43 = vadd.f32 %v308_v23, %v307_v47  ;;  %v334_v14 = vadd.f32 %v333_v48, %v2292_v4  ;;  %v388_v11 = vmul.f32 %v1913_v29, %v1913_v29 }
  0x48   :  { %3736 = vst [vmem:[#allocation76_spill] sm:$0xff] %v2292_v4  ;;  %v2303_v16 = vld [vmem:[#allocation2 + $0x440] sm:$0xff]  ;;  %v2307_v3 = vld [vmem:[#allocation2 + $0x3f8] sm:$0xff]  ;;  %v2310_v7 = vld [vmem:[#allocation2 + $0x3a8] sm:$0xff]  ;;  %v323_v49 = vadd.f32 %v322_v44, %v2273_v38  ;;  %v349_v28 = vadd.f32 %v348_v60, %v2290_v37 }
  0x49   :  { %3737 = vst [vmem:[#allocation77_spill] sm:$0xff] %v2303_v16  ;;  %v2315_v21 = vld [vmem:[#allocation2 + $0x458] sm:$0xff]  ;;  %v2318_v17 = vld [vmem:[#allocation2 + $0x400] sm:$0xff]  ;;  %v339_v2 = vadd.f32 %v2307_v3, %v2305_v42  ;;  %v2323_v13 = vld [vmem:[#allocation2 + $0x448] sm:$0xff]  ;;  %310 = vadd.xlane.f32.xlu0 %v309_v43  ;;  %v336_v22 = vadd.f32 %v335_v62, %v334_v14  ;;  %v389_v43 = vmul.f32 %v1915_v30, %v1915_v30 }
  0x4a   :  { %3738 = vst [vmem:[#allocation78_spill] sm:$0xff] %v2315_v21  ;;  %3739 = vst [vmem:[#allocation79_spill] sm:$0xff] %v2318_v17  ;;  %v2325_v40 = vld [vmem:[#allocation2 + $0x408] sm:$0xff]  ;;  %v2327_v44 = vld [vmem:[#allocation2 + $0x460] sm:$0xff]  ;;  %v324_v60 = vadd.f32 %v323_v49, %v2296_v8  ;;  %v350_v37 = vadd.f32 %v349_v28, %v2303_v16  ;;  %v353_v20 = vsel %vm181_vm0, %v2315_v21, 0.0  ;;  %v553_v16 = vadd.f32 %v552_v27, %v399_v25 }
  0x4b   :  { %3740 = vst [vmem:[#allocation80_spill] sm:$0xff] %v2323_v13  ;;  %3741 = vst [vmem:[#allocation81_spill] sm:$0xff] %v2327_v44  ;;  %v2333_v38 = vld [vmem:[#allocation2 + $0x420] sm:$0xff]  ;;  %v340_v47 = vadd.f32 %v339_v2, %v2318_v17  ;;  %v2336_v23 = vld [vmem:[#allocation2 + $0x468] sm:$0xff]  ;;  %337 = vadd.xlane.f32.xlu1 %v336_v22 }
  0x4c   :  { %3742 = vst [vmem:[#allocation82_spill] sm:$0xff] %v2336_v23  ;;  %v2338_v48 = vld [vmem:[#allocation2 + $0x470] sm:$0xff]  ;;  %v357_v2 = vadd.f32 %v2336_v23, %v2327_v44  ;;  %v325_v4 = vadd.f32 %v324_v60, %v2310_v7  ;;  %v351_v17 = vadd.f32 %v350_v37, %v2323_v13  ;;  %v2355_v62 = vld [vmem:[#allocation2 + $0x478] sm:$0xff]  ;;  %v344_v21 = vsel %vm181_vm0, %v2333_v38, 0.0  ;;  %v2370_v30 = vld [vmem:[#allocation2 + $0x480] sm:$0xff] }
  0x4d   :  { %v2342_v31 = vld [vmem:[#allocation2 + $0x450] sm:$0xff]  ;;  %v341_v29 = vadd.f32 %v340_v47, %v2325_v40  ;;  %v2359_v14 = vld [vmem:[#allocation2 + $0x418] sm:$0xff]  ;;  %v390_v37 = vmul.f32 %v1918_v34, %v1918_v34  ;;  %v2372_v22 = vadd.f32 %v554_v18, %v553_v16  ;;  %v540_v44 = vadd.f32 %v388_v11, %v387_v61 }
  0x4e   :  { %v2346_v49 = vld [vmem:[#allocation2 + $0x410] sm:$0xff]  ;;  %v358_v23 = vadd.f32 %v357_v2, %v2338_v48  ;;  %v327_v25 = vadd.f32 %v326_v57, %v325_v4  ;;  %v352_v60 = vadd.f32 %v351_v17, %v2342_v31  ;;  %v408_v2 = vmul.f32 %v2005_v52, %v2005_v52  ;;  %v2380_v57 = vld [vmem:[#allocation2 + $0x488] sm:$0xff] }
  0x4f   :  { %v2348_v28 = vld [vmem:[#allocation2 + $0x490] sm:$0xff]  ;;  %v342_v47 = vadd.f32 %v341_v29, %v2346_v49  ;;  %v393_v17 = vmul.f32 %v1920_v35, %v1920_v35  ;;  %v410_v16 = vmul.f32 %v2018_v1, %v2018_v1  ;;  %v391_v52 = vmul.f32 %v1930_v46, %v1930_v46 }
  0x50   :  { %3743 = vst [vmem:[#allocation83_spill] sm:$0xff] %v2348_v28  ;;  %v362_v27 = vsel %vm181_vm0, %v2348_v28, 0.0  ;;  %v359_v13 = vadd.f32 %v358_v23, %v2355_v62  ;;  %v409_v28 = vmul.f32 %v2007_v56, %v2007_v56  ;;  %328 = vadd.xlane.f32.xlu0 %v327_v25  ;;  %v354_v34 = vadd.f32 %v353_v20, %v352_v60 }
  0x51   :  { %v343_v4 = vadd.f32 %v342_v47, %v2359_v14  ;;  %v392_v56 = vmul.f32 %v1941_v58, %v1941_v58  ;;  %v541_v61 = vadd.f32 %v540_v44, %v389_v43  ;;  %v411_v11 = vmul.f32 %v2027_v10, %v2027_v10 }
  0x52   :  { %v360_v18 = vadd.f32 %v359_v13, %v2370_v30  ;;  %355 = vadd.xlane.f32.xlu1 %v354_v34  ;;  %v414_v35 = vmul.f32 %v2037_v26, %v2037_v26  ;;  %v567_v20 = vadd.f32 %v409_v28, %v408_v2  ;;  %v401_v13 = vmul.f32 %v1937_v54, %v1937_v54  ;;  %v3745_v2 = vld [vmem:[#allocation9_spill] sm:$0xff] }
  0x53   :  { %v345_v23 = vadd.f32 %v344_v21, %v343_v4  ;;  %v542_v29 = vadd.f32 %v541_v61, %v390_v37  ;;  %v402_v46 = vmul.f32 %v1939_v55, %v1939_v55  ;;  %v545_v58 = vsel %vm181_vm0, %v393_v17, 0.0  ;;  %v3746_v17 = vld [vmem:[#allocation29_spill] sm:$0xff] }
  0x54   :  { %v361_v1 = vadd.f32 %v360_v18, %v2380_v57  ;;  %v412_v21 = vmul.f32 %v2044_v45, %v2044_v45  ;;  %v568_v10 = vadd.f32 %v567_v20, %v410_v16  ;;  %v403_v26 = vmul.f32 %v1949_v63, %v1949_v63  ;;  %v3747_v18 = vld [vmem:[#allocation22_spill] sm:$0xff]  ;;  %v3750_v20 = vld [vmem:[#allocation27_spill] sm:$0xff] }
  0x55   :  { %346 = vadd.xlane.f32.xlu0 %v345_v23  ;;  %v543_v28 = vadd.f32 %v542_v29, %v391_v52  ;;  %v413_v43 = vmul.f32 %v2067_v15, %v2067_v15  ;;  %v404_v54 = vmul.f32 %v1957_v5, %v1957_v5  ;;  %v407_v37 = vmul.f32 %v1973_v19, %v1973_v19  ;;  %v3749_v23 = vld [vmem:[#allocation11_spill] sm:$0xff] }
  0x56   :  { %v363_v44 = vadd.f32 %v362_v27, %v361_v1  ;;  %520 = vadd.xlane.f32.xlu1 %v2052_v50  ;;  %v569_v55 = vadd.f32 %v568_v10, %v411_v11  ;;  %v558_v25 = vadd.f32 %v402_v46, %v401_v13  ;;  %v422_v45 = vmul.f32 %v2059_v59, %v2059_v59  ;;  %v3744_v50 = vld [vmem:[#allocation8_spill] sm:$0xff] }
  0x57   :  { %v544_v60 = vadd.f32 %v543_v28, %v392_v56  ;;  %v572_v63 = vsel %vm181_vm0, %v414_v35, 0.0  ;;  %v423_v27 = vmul.f32 %v2061_v24, %v2061_v24  ;;  %v424_v15 = vmul.f32 %v2063_v51, %v2063_v51  ;;  %v3748_v56 = vld [vmem:[#allocation10_spill] sm:$0xff] }
  0x58   :  { %v570_v5 = vadd.f32 %v569_v55, %v412_v21  ;;  %v405_v47 = vmul.f32 %v3744_v50, %v3744_v50  ;;  %v406_v19 = vmul.f32 %v3745_v2, %v3745_v2  ;;  %v559_v34 = vadd.f32 %v558_v25, %v403_v26  ;;  %v3752_v26 = vld [vmem:[#allocation13_spill] sm:$0xff]  ;;  %v3754_v25 = vld [vmem:[#allocation14_spill] sm:$0xff]  ;;  %v3758_v50 = vld [vmem:[#allocation16_spill] sm:$0xff] }
  0x59   :  { %364 = vadd.xlane.f32.xlu0 %v363_v44  ;;  %v563_v59 = vsel %vm181_vm0, %v407_v37, 0.0  ;;  %v425_v4 = vmul.f32 %v2082_v12, %v2082_v12  ;;  %v428_v24 = vmul.f32 %v3746_v17, %v3746_v17  ;;  %v585_v16 = vadd.f32 %v423_v27, %v422_v45  ;;  %v3751_v12 = vld [vmem:[#allocation12_spill] sm:$0xff]  ;;  %v3755_v45 = vld [vmem:[#allocation33_spill] sm:$0xff] }
  0x5a   :  { %538 = vadd.xlane.f32.xlu1 %v3747_v18  ;;  %v571_v51 = vadd.f32 %v570_v5, %v413_v43  ;;  %v560_v52 = vadd.f32 %v559_v34, %v404_v54  ;;  %v415_v61 = vmul.f32 %v3748_v56, %v3748_v56  ;;  %v416_v11 = vmul.f32 %v3749_v23, %v3749_v23  ;;  %v3753_v54 = vld [vmem:[#allocation31_spill] sm:$0xff]  ;;  %v3762_v56 = vld [vmem:[#allocation18_spill] sm:$0xff] }
  0x5b   :  { %v546_v35 = vadd.f32 %v545_v58, %v544_v60  ;;  %v426_v1 = vmul.f32 %v3750_v20, %v3750_v20  ;;  %v586_v29 = vadd.f32 %v585_v16, %v424_v15  ;;  %v417_v13 = vmul.f32 %v3751_v12, %v3751_v12  ;;  %v3756_v60 = vld [vmem:[#allocation34_spill] sm:$0xff]  ;;  %v3757_v5 = vld [vmem:[#allocation15_spill] sm:$0xff] }
  0x5c   :  { %v561_v46 = vadd.f32 %v560_v52, %v405_v47  ;;  %v427_v21 = vmul.f32 %v2101_v9, %v2101_v9  ;;  %v590_v10 = vsel %vm181_vm0, %v428_v24, 0.0  ;;  %v418_v44 = vmul.f32 %v3752_v26, %v3752_v26 }
  0x5d   :  { %529 = vadd.xlane.f32.xlu0 %v2247_v0  ;;  %v573_v28 = vadd.f32 %v572_v63, %v571_v51  ;;  %v587_v58 = vadd.f32 %v586_v29, %v425_v4  ;;  %v576_v43 = vadd.f32 %v416_v11, %v415_v61  ;;  %v436_v55 = vmul.f32 %v3753_v54, %v3753_v54  ;;  %v3760_v4 = vld [vmem:[#allocation37_spill] sm:$0xff] }
  0x5e   :  { %556 = vadd.xlane.f32.xlu1 %v2372_v22  ;;  %v562_v37 = vadd.f32 %v561_v46, %v406_v19  ;;  %v421_v0 = vmul.f32 %v3754_v25, %v3754_v25  ;;  %v437_v9 = vmul.f32 %v3755_v45, %v3755_v45  ;;  %v438_v27 = vmul.f32 %v3756_v60, %v3756_v60  ;;  %v3759_v19 = vld [vmem:[#allocation36_spill] sm:$0xff]  ;;  %v3761_v51 = vld [vmem:[#allocation17_spill] sm:$0xff]  ;;  %v3768_v25 = vld [vmem:[#allocation23_spill] sm:$0xff] }
  0x5f   :  { %v588_v15 = vadd.f32 %v587_v58, %v426_v1  ;;  %v419_v63 = vmul.f32 %v3757_v5, %v3757_v5  ;;  %v420_v47 = vmul.f32 %v3758_v50, %v3758_v50  ;;  %v577_v2 = vadd.f32 %v576_v43, %v417_v13  ;;  %v3765_v58 = vld [vmem:[#allocation21_spill] sm:$0xff]  ;;  %v3769_v45 = vld [vmem:[#allocation26_spill] sm:$0xff] }
  0x60   :  { %v564_v22 = vadd.f32 %v563_v59, %v562_v37  ;;  %v439_v34 = vmul.f32 %v3759_v19, %v3759_v19  ;;  %v442_v17 = vmul.f32 %v3760_v4, %v3760_v4  ;;  %v603_v24 = vadd.f32 %v437_v9, %v436_v55  ;;  %v3767_v55 = vld [vmem:[#allocation46_spill] sm:$0xff] }
  0x61   :  { %547 = vadd.xlane.f32.xlu0 %v546_v35  ;;  %v589_v16 = vadd.f32 %v588_v15, %v427_v21  ;;  %v578_v18 = vadd.f32 %v577_v2, %v418_v44  ;;  %v429_v52 = vmul.f32 %v3761_v51, %v3761_v51  ;;  %v430_v61 = vmul.f32 %v3762_v56, %v3762_v56  ;;  %v3763_v35 = vld [vmem:[#allocation19_spill] sm:$0xff]  ;;  %v3764_v21 = vld [vmem:[#allocation20_spill] sm:$0xff]  ;;  %v3771_v5 = vld [vmem:[#allocation50_spill] sm:$0xff] }
  0x62   :  { %574 = vadd.xlane.f32.xlu1 %v573_v28  ;;  %v581_v23 = vsel %vm181_vm0, %v421_v0, 0.0  ;;  %v440_v59 = vmul.f32 %v2147_v33, %v2147_v33  ;;  %v604_v11 = vadd.f32 %v603_v24, %v438_v27  ;;  %v431_v20 = vmul.f32 %v3763_v35, %v3763_v35  ;;  %v3770_v27 = vld [vmem:[#allocation48_spill] sm:$0xff]  ;;  %v3776_v35 = vld [vmem:[#allocation30_spill] sm:$0xff] }
  0x63   :  { %v591_v1 = vadd.f32 %v590_v10, %v589_v16  ;;  %v579_v29 = vadd.f32 %v578_v18, %v419_v63  ;;  %v441_v12 = vmul.f32 %v2154_v41, %v2154_v41  ;;  %v608_v13 = vsel %vm181_vm0, %v442_v17, 0.0  ;;  %v3766_v10 = vld [vmem:[#allocation43_spill] sm:$0xff]  ;;  %v3774_v18 = vld [vmem:[#allocation28_spill] sm:$0xff] }
  0x64   :  { %v605_v46 = vadd.f32 %v604_v11, %v439_v34  ;;  %v432_v26 = vmul.f32 %v3764_v21, %v3764_v21  ;;  %v594_v44 = vadd.f32 %v430_v61, %v429_v52  ;;  %v450_v33 = vmul.f32 %v2158_v32, %v2158_v32  ;;  %v3773_v34 = vld [vmem:[#allocation25_spill] sm:$0xff]  ;;  %v3775_v61 = vld [vmem:[#allocation58_spill] sm:$0xff] }
  0x65   :  { %565 = vadd.xlane.f32.xlu0 %v564_v22  ;;  %v580_v28 = vadd.f32 %v579_v29, %v420_v47  ;;  %v435_v43 = vmul.f32 %v3765_v58, %v3765_v58  ;;  %v451_v54 = vmul.f32 %v3766_v10, %v3766_v10  ;;  %v452_v41 = vmul.f32 %v3767_v55, %v3767_v55  ;;  %v3772_v22 = vld [vmem:[#allocation24_spill] sm:$0xff]  ;;  %v3777_v29 = vld [vmem:[#allocation55_spill] sm:$0xff]  ;;  %v3782_v10 = vld [vmem:[#allocation41_spill] sm:$0xff] }
  0x66   :  { %592 = vadd.xlane.f32.xlu1 %v591_v1  ;;  %v606_v37 = vadd.f32 %v605_v46, %v440_v59  ;;  %v433_v0 = vmul.f32 %v3768_v25, %v3768_v25  ;;  %v434_v9 = vmul.f32 %v3769_v45, %v3769_v45  ;;  %v595_v60 = vadd.f32 %v594_v44, %v431_v20  ;;  %v3778_v46 = vld [vmem:[#allocation32_spill] sm:$0xff]  ;;  %v3780_v44 = vld [vmem:[#allocation57_spill] sm:$0xff]  ;;  %v3781_v58 = vld [vmem:[#allocation35_spill] sm:$0xff] }
  0x67   :  { %v582_v32 = vadd.f32 %v581_v23, %v580_v28  ;;  %v453_v15 = vmul.f32 %v3770_v27, %v3770_v27  ;;  %v456_v63 = vmul.f32 %v3771_v5, %v3771_v5  ;;  %v621_v50 = vadd.f32 %v451_v54, %v450_v33  ;;  %v3783_v25 = vld [vmem:[#allocation65_spill] sm:$0xff] }
  0x68   :  { %v607_v47 = vadd.f32 %v606_v37, %v441_v12  ;;  %v596_v2 = vadd.f32 %v595_v60, %v432_v26  ;;  %v443_v19 = vmul.f32 %v3772_v22, %v3772_v22  ;;  %v444_v4 = vmul.f32 %v3773_v34, %v3773_v34 }
  0x69   :  { %583 = vadd.xlane.f32.xlu0 %v582_v32  ;;  %v599_v17 = vsel %vm181_vm0, %v435_v43, 0.0  ;;  %v454_v24 = vmul.f32 %v2197_v53, %v2197_v53  ;;  %v622_v16 = vadd.f32 %v621_v50, %v452_v41  ;;  %v445_v51 = vmul.f32 %v3774_v18, %v3774_v18  ;;  %v3784_v32 = vld [vmem:[#allocation38_spill] sm:$0xff]  ;;  %v3786_v50 = vld [vmem:[#allocation63_spill] sm:$0xff] }
  0x6a   :  { %v609_v52 = vadd.f32 %v608_v13, %v607_v47  ;;  %v597_v56 = vadd.f32 %v596_v2, %v433_v0  ;;  %v455_v23 = vmul.f32 %v3775_v61, %v3775_v61  ;;  %v626_v59 = vsel %vm181_vm0, %v456_v63, 0.0  ;;  %v3779_v13 = vld [vmem:[#allocation56_spill] sm:$0xff] }
  0x6b   :  { %v623_v11 = vadd.f32 %v622_v16, %v453_v15  ;;  %v446_v20 = vmul.f32 %v3776_v35, %v3776_v35  ;;  %v612_v1 = vadd.f32 %v444_v4, %v443_v19  ;;  %v464_v12 = vmul.f32 %v3777_v29, %v3777_v29  ;;  %v3785_v15 = vld [vmem:[#allocation39_spill] sm:$0xff]  ;;  %v3788_v16 = vld [vmem:[#allocation42_spill] sm:$0xff] }
  0x6c   :  { %610 = vadd.xlane.f32.xlu1 %v609_v52  ;;  %v598_v53 = vadd.f32 %v597_v56, %v434_v9  ;;  %v449_v21 = vmul.f32 %v3778_v46, %v3778_v46  ;;  %v465_v26 = vmul.f32 %v3779_v13, %v3779_v13  ;;  %v466_v33 = vmul.f32 %v3780_v44, %v3780_v44  ;;  %v3789_v52 = vld [vmem:[#allocation67_spill] sm:$0xff]  ;;  %v3795_v44 = vld [vmem:[#allocation72_spill] sm:$0xff] }
  0x6d   :  { %v624_v28 = vadd.f32 %v623_v11, %v454_v24  ;;  %v447_v43 = vmul.f32 %v3781_v58, %v3781_v58  ;;  %v448_v54 = vmul.f32 %v3782_v10, %v3782_v10  ;;  %v613_v55 = vadd.f32 %v612_v1, %v445_v51  ;;  %v3792_v1 = vld [vmem:[#allocation47_spill] sm:$0xff]  ;;  %v3796_v10 = vld [vmem:[#allocation49_spill] sm:$0xff] }
  0x6e   :  { %v600_v41 = vadd.f32 %v599_v17, %v598_v53  ;;  %v467_v37 = vmul.f32 %v2231_v39, %v2231_v39  ;;  %v470_v0 = vmul.f32 %v3783_v25, %v3783_v25  ;;  %v639_v45 = vadd.f32 %v465_v26, %v464_v12  ;;  %v3787_v39 = vld [vmem:[#allocation40_spill] sm:$0xff]  ;;  %v3793_v12 = vld [vmem:[#allocation45_spill] sm:$0xff]  ;;  %v3794_v13 = vld [vmem:[#allocation71_spill] sm:$0xff] }
  0x6f   :  { %v625_v9 = vadd.f32 %v624_v28, %v455_v23  ;;  %v614_v60 = vadd.f32 %v613_v55, %v446_v20  ;;  %v457_v27 = vmul.f32 %v3784_v32, %v3784_v32  ;;  %v458_v5 = vmul.f32 %v3785_v15, %v3785_v15  ;;  %v3790_v23 = vld [vmem:[#allocation44_spill] sm:$0xff]  ;;  %v3799_v15 = vld [vmem:[#allocation53_spill] sm:$0xff] }
  0x70   :  { %601 = vadd.xlane.f32.xlu0 %v600_v41  ;;  %v617_v63 = vsel %vm181_vm0, %v449_v21, 0.0  ;;  %v468_v47 = vmul.f32 %v3786_v50, %v3786_v50  ;;  %v640_v2 = vadd.f32 %v639_v45, %v466_v33  ;;  %v459_v22 = vmul.f32 %v3787_v39, %v3787_v39  ;;  %v3798_v25 = vld [vmem:[#allocation52_spill] sm:$0xff]  ;;  %v3800_v39 = vld [vmem:[#allocation79_spill] sm:$0xff] }
  0x71   :  { %v627_v19 = vadd.f32 %v626_v59, %v625_v9  ;;  %v615_v34 = vadd.f32 %v614_v60, %v447_v43  ;;  %v469_v4 = vmul.f32 %v2250_v36, %v2250_v36  ;;  %v644_v17 = vsel %vm181_vm0, %v470_v0, 0.0  ;;  %v3791_v59 = vld [vmem:[#allocation69_spill] sm:$0xff] }
  0x72   :  { %v641_v24 = vadd.f32 %v640_v2, %v467_v37  ;;  %v460_v18 = vmul.f32 %v3788_v16, %v3788_v16  ;;  %v630_v51 = vadd.f32 %v458_v5, %v457_v27  ;;  %v478_v56 = vmul.f32 %v3789_v52, %v3789_v52 }
  0x73   :  { %628 = vadd.xlane.f32.xlu1 %v627_v19  ;;  %v616_v61 = vadd.f32 %v615_v34, %v448_v54  ;;  %v461_v11 = vmul.f32 %v3790_v23, %v3790_v23  ;;  %v479_v35 = vmul.f32 %v3791_v59, %v3791_v59  ;;  %v480_v36 = vmul.f32 %v2267_v6, %v2267_v6  ;;  %v3797_v54 = vld [vmem:[#allocation51_spill] sm:$0xff] }
  0x74   :  { %v642_v20 = vadd.f32 %v641_v24, %v468_v47  ;;  %v462_v29 = vmul.f32 %v3792_v1, %v3792_v1  ;;  %v463_v53 = vmul.f32 %v3793_v12, %v3793_v12  ;;  %v631_v46 = vadd.f32 %v630_v51, %v459_v22  ;;  %v3806_v1 = vld [vmem:[#allocation64_spill] sm:$0xff] }
  0x75   :  { %v618_v21 = vadd.f32 %v617_v63, %v616_v61  ;;  %v481_v26 = vmul.f32 %v3794_v13, %v3794_v13  ;;  %v484_v33 = vmul.f32 %v3795_v44, %v3795_v44  ;;  %v657_v28 = vadd.f32 %v479_v35, %v478_v56  ;;  %v3804_v61 = vld [vmem:[#allocation60_spill] sm:$0xff]  ;;  %v3807_v13 = vld [vmem:[#allocation66_spill] sm:$0xff] }
  0x76   :  { %v643_v58 = vadd.f32 %v642_v20, %v469_v4  ;;  %v632_v43 = vadd.f32 %v631_v46, %v460_v18  ;;  %v471_v6 = vmul.f32 %v3796_v10, %v3796_v10  ;;  %v472_v55 = vmul.f32 %v3797_v54, %v3797_v54  ;;  %v3802_v4 = vld [vmem:[#allocation54_spill] sm:$0xff] }
  0x77   :  { %619 = vadd.xlane.f32.xlu0 %v618_v21  ;;  %v482_v41 = vmul.f32 %v2296_v8, %v2296_v8  ;;  %v658_v37 = vadd.f32 %v657_v28, %v480_v36  ;;  %v473_v0 = vmul.f32 %v3798_v25, %v3798_v25  ;;  %v635_v60 = vsel %vm181_vm0, %v463_v53, 0.0  ;;  %v3809_v28 = vld [vmem:[#allocation68_spill] sm:$0xff] }
  0x78   :  { %v645_v45 = vadd.f32 %v644_v17, %v643_v58  ;;  %v633_v9 = vadd.f32 %v632_v43, %v461_v11  ;;  %v483_v32 = vmul.f32 %v2310_v7, %v2310_v7  ;;  %v474_v5 = vmul.f32 %v3799_v15, %v3799_v15  ;;  %v3801_v7 = vld [vmem:[#allocation59_spill] sm:$0xff]  ;;  %v3805_v11 = vld [vmem:[#allocation61_spill] sm:$0xff]  ;;  %v3810_v43 = vld [vmem:[#allocation82_spill] sm:$0xff] }
  0x79   :  { %v659_v27 = vadd.f32 %v658_v37, %v481_v26  ;;  %v648_v63 = vadd.f32 %v472_v55, %v471_v6  ;;  %v492_v50 = vmul.f32 %v2305_v42, %v2305_v42  ;;  %v662_v47 = vsel %vm181_vm0, %v484_v33, 0.0  ;;  %v3803_v42 = vld [vmem:[#allocation62_spill] sm:$0xff]  ;;  %v3813_v15 = vld [vmem:[#allocation73_spill] sm:$0xff] }
  0x7a   :  { %646 = vadd.xlane.f32.xlu1 %v645_v45  ;;  %v634_v8 = vadd.f32 %v633_v9, %v462_v29  ;;  %v493_v2 = vmul.f32 %v2307_v3, %v2307_v3  ;;  %v494_v22 = vmul.f32 %v3800_v39, %v3800_v39  ;;  %v475_v34 = vmul.f32 %v3801_v7, %v3801_v7  ;;  %v3811_v55 = vld [vmem:[#allocation70_spill] sm:$0xff]  ;;  %v3816_v7 = vld [vmem:[#allocation83_spill] sm:$0xff] }
  0x7b   :  { %v660_v19 = vadd.f32 %v659_v27, %v482_v41  ;;  %v477_v17 = vmul.f32 %v3802_v4, %v3802_v4  ;;  %v649_v24 = vadd.f32 %v648_v63, %v473_v0  ;;  %v476_v18 = vmul.f32 %v3803_v42, %v3803_v42  ;;  %v3812_v0 = vld [vmem:[#allocation76_spill] sm:$0xff] }
  0x7c   :  { %v636_v16 = vadd.f32 %v635_v60, %v634_v8  ;;  %v495_v51 = vmul.f32 %v2325_v40, %v2325_v40  ;;  %v675_v52 = vadd.f32 %v493_v2, %v492_v50  ;;  %v485_v23 = vmul.f32 %v3804_v61, %v3804_v61  ;;  %v3815_v2 = vld [vmem:[#allocation75_spill] sm:$0xff]  ;;  %v3819_v61 = vld [vmem:[#allocation78_spill] sm:$0xff] }
  0x7d   :  { %v661_v3 = vadd.f32 %v660_v19, %v483_v32  ;;  %v650_v56 = vadd.f32 %v649_v24, %v474_v5  ;;  %v486_v59 = vmul.f32 %v3805_v11, %v3805_v11  ;;  %v496_v35 = vmul.f32 %v2346_v49, %v2346_v49  ;;  %v3808_v49 = vld [vmem:[#allocation81_spill] sm:$0xff]  ;;  %v3814_v5 = vld [vmem:[#allocation74_spill] sm:$0xff] }
  0x7e   :  { %637 = vadd.xlane.f32.xlu0 %v636_v16  ;;  %v498_v36 = vmul.f32 %v2333_v38, %v2333_v38  ;;  %v676_v20 = vadd.f32 %v675_v52, %v494_v22  ;;  %v487_v40 = vmul.f32 %v3806_v1, %v3806_v1  ;;  %v653_v53 = vsel %vm181_vm0, %v477_v17, 0.0  ;;  %v3817_v17 = vld [vmem:[#allocation77_spill] sm:$0xff] }
  0x7f   :  { %v663_v29 = vadd.f32 %v662_v47, %v661_v3  ;;  %v651_v12 = vadd.f32 %v650_v56, %v475_v34  ;;  %v497_v46 = vmul.f32 %v2359_v14, %v2359_v14  ;;  %v488_v26 = vmul.f32 %v3807_v13, %v3807_v13 }
  0x80   :  { %v677_v21 = vadd.f32 %v676_v20, %v495_v51  ;;  %v666_v44 = vadd.f32 %v486_v59, %v485_v23  ;;  %v506_v33 = vmul.f32 %v3808_v49, %v3808_v49  ;;  %v491_v58 = vmul.f32 %v3809_v28, %v3809_v28  ;;  %v3818_v51 = vld [vmem:[#allocation80_spill] sm:$0xff] }
  0x81   :  { %664 = vadd.xlane.f32.xlu1 %v663_v29  ;;  %v652_v38 = vadd.f32 %v651_v12, %v476_v18  ;;  %v507_v10 = vmul.f32 %v3810_v43, %v3810_v43  ;;  %v508_v6 = vmul.f32 %v2338_v48, %v2338_v48  ;;  %v680_v54 = vsel %vm181_vm0, %v498_v36, 0.0 }
  0x82   :  { %v678_v14 = vadd.f32 %v677_v21, %v496_v35  ;;  %v489_v41 = vmul.f32 %v3811_v55, %v3811_v55  ;;  %v667_v37 = vadd.f32 %v666_v44, %v487_v40  ;;  %v490_v45 = vmul.f32 %v3812_v0, %v3812_v0 }
  0x83   :  { %v654_v25 = vadd.f32 %v653_v53, %v652_v38  ;;  %v509_v9 = vmul.f32 %v2355_v62, %v2355_v62  ;;  %v693_v60 = vadd.f32 %v507_v10, %v506_v33  ;;  %v499_v48 = vmul.f32 %v3813_v15, %v3813_v15 }
  0x84   :  { %v679_v32 = vadd.f32 %v678_v14, %v497_v46  ;;  %v668_v27 = vadd.f32 %v667_v37, %v488_v26  ;;  %v500_v63 = vmul.f32 %v3814_v5, %v3814_v5  ;;  %v671_v50 = vsel %vm181_vm0, %v491_v58, 0.0 }
  0x85   :  { %655 = vadd.xlane.f32.xlu0 %v654_v25  ;;  %v510_v8 = vmul.f32 %v2370_v30, %v2370_v30  ;;  %v694_v47 = vadd.f32 %v693_v60, %v508_v6  ;;  %v501_v39 = vmul.f32 %v3815_v2, %v3815_v2  ;;  %v511_v19 = vmul.f32 %v2380_v57, %v2380_v57 }
  0x86   :  { %v681_v62 = vadd.f32 %v680_v54, %v679_v32  ;;  %v669_v22 = vadd.f32 %v668_v27, %v489_v41  ;;  %v512_v34 = vmul.f32 %v3816_v7, %v3816_v7  ;;  %v502_v24 = vmul.f32 %v3817_v17, %v3817_v17 }
  0x87   :  { %v695_v4 = vadd.f32 %v694_v47, %v509_v9  ;;  %v684_v16 = vadd.f32 %v500_v63, %v499_v48  ;;  %v1869_v30 = vmov 0   ;;  %v503_v52 = vmul.f32 %v3818_v51, %v3818_v51 }
  0x88   :  { %682 = vadd.xlane.f32.xlu1 %v681_v62  ;;  %v670_v42 = vadd.f32 %v669_v22, %v490_v45  ;;  %1627 = vset.pattern.permute.xlu0 %v1869_v30  ;;  %v698_v57 = vsel %vm181_vm0, %v512_v34, 0.0  ;;  %v505_v23 = vmul.f32 %v3819_v61, %v3819_v61  ;;  %v504_v59 = vmul.f32 %v2342_v31, %v2342_v31 }
  0x89   :  { %v696_v18 = vadd.f32 %v695_v4, %v510_v8  ;;  %v685_v3 = vadd.f32 %v684_v16, %v501_v39  ;;  %1628 = vset.pattern.permute.xlu1 %v1869_v30 }
  0x8a   :  { %v672_v56 = vadd.f32 %v671_v50, %v670_v42  ;;  %v689_v1 = vsel %vm181_vm0, %v505_v23, 0.0 }
  0x8b   :  { %v697_v11 = vadd.f32 %v696_v18, %v511_v19  ;;  %v686_v35 = vadd.f32 %v685_v3, %v502_v24 }
  0x8c   :  { %673 = vadd.xlane.f32.xlu0 %v672_v56 }
  0x8d   :  { %v699_v36 = vadd.f32 %v698_v57, %v697_v11  ;;  %v687_v20 = vadd.f32 %v686_v35, %v503_v52 }
  0x8f   :  { %700 = vadd.xlane.f32.xlu1 %v699_v36  ;;  %v688_v40 = vadd.f32 %v687_v20, %v504_v59 }
  0x91   :  { %v690_v29 = vadd.f32 %v689_v1, %v688_v40 }
  0x93   :  { %691 = vadd.xlane.f32.xlu0 %v690_v29 }
  0xad   :  { %v203_v12 = vpop.xlane.xlu1 %202 }
  0xae   :  { %v2659_v0 = vmul.f32 0.0012755102, %v203_v12  ;;  %v849_v12 = vld [vmem:[%s3589_s1] sm:$0xff] }
  0xb0   :  { %v185_v53 = vpop.xlane.xlu0 %184  ;;  %v746_v48 = vmul.f32 %v2659_v0, %v2659_v0 }
  0xb1   :  { %v2655_v41 = vmul.f32 0.0012755102, %v185_v53 }
  0xb2   :  { %v212_v46 = vpop.xlane.xlu1 %211 }
  0xb3   :  { %v744_v45 = vmul.f32 %v2655_v41, %v2655_v41  ;;  %v2669_v50 = vmul.f32 0.0012755102, %v212_v46 }
  0xb4   :  { %v194_v21 = vpop.xlane.xlu0 %193 }
  0xb5   :  { %v2663_v60 = vmul.f32 0.0012755102, %v194_v21  ;;  %v747_v17 = vmul.f32 %v2669_v50, %v2669_v50 }
  0xb6   :  { %v230_v13 = vpop.xlane.xlu1 %229 }
  0xb7   :  { %v745_v8 = vmul.f32 %v2663_v60, %v2663_v60  ;;  %v2677_v16 = vmul.f32 0.0012755102, %v230_v13 }
  0xb9   :  { %v221_v26 = vpop.xlane.xlu0 %220  ;;  %v749_v11 = vmul.f32 %v2677_v16, %v2677_v16 }
  0xba   :  { %v2673_v2 = vmul.f32 0.0012755102, %v221_v26 }
  0xbc   :  { %v2631_v44 = vpop.xlane.xlu1 %247  ;;  %v748_v42 = vmul.f32 %v2673_v2, %v2673_v2 }
  0xbd   :  { %v2691_v21 = vmul.f32 0.0012755102, %v2631_v44 }
  0xbe   :  { %v239_v49 = vpop.xlane.xlu0 %238 }
  0xbf   :  { %v2681_v61 = vmul.f32 0.0012755102, %v239_v49 }
  0xc1   :  { %v2633_v31 = vpop.xlane.xlu1 %265  ;;  %v750_v53 = vmul.f32 %v2681_v61, %v2681_v61 }
  0xc3   :  { %v2635_v33 = vpop.xlane.xlu0 %256 }
  0xc6   :  { %v2637_v38 = vpop.xlane.xlu1 %283 }
  0xca   :  { %v2639_v28 = vpop.xlane.xlu0 %274 }
  0xcc   :  { %v2641_v58 = vpop.xlane.xlu1 %301 }
  0xcf   :  { %v2643_v43 = vpop.xlane.xlu0 %292 }
  0xd3   :  { %v2645_v10 = vpop.xlane.xlu1 %319 }
  0xd6   :  { %v2647_v6 = vpop.xlane.xlu0 %310 }
  0xd8   :  { %v2649_v14 = vpop.xlane.xlu1 %337 }
  0xdd   :  { %v2651_v54 = vpop.xlane.xlu0 %328 }
  0xdf   :  { %v2653_v55 = vpop.xlane.xlu1 %355 }
  0xe2   :  { %v2657_v37 = vpop.xlane.xlu0 %346 }
  0xe3   :  { %v521_v25 = vpop.xlane.xlu1 %520 }
  0xe4   :  { %v723_v9 = vmul.f32 0.0012755102, %v521_v25 }
  0xe6   :  { %v2665_v32 = vpop.xlane.xlu0 %364  ;;  %v765_v27 = vsub.f32 %v723_v9, %v744_v45 }
  0xe7   :  { %v539_v15 = vpop.xlane.xlu1 %538 }
  0xe8   :  { %v786_v5 = vmax.f32 %v765_v27, 0.0  ;;  %v725_v63 = vmul.f32 0.0012755102, %v539_v15  ;;  %v2696_v27 = vmul.f32 0.0012755102, %v2635_v33  ;;  %v751_v15 = vmul.f32 %v2691_v21, %v2691_v21 }
  0xea   :  { %v530_v47 = vpop.xlane.xlu0 %529  ;;  %v807_v39 = vadd.f32 1e-05, %v786_v5  ;;  %v767_v62 = vsub.f32 %v725_v63, %v746_v48  ;;  %v2702_v48 = vmul.f32 0.0012755102, %v2633_v31  ;;  %v850_v5 = vld [vmem:[%s3589_s1 + $0x8] sm:$0xff] }
  0xeb   :  { %v724_v22 = vmul.f32 0.0012755102, %v530_v47  ;;  %v557_v19 = vpop.xlane.xlu1 %556 }
  0xec   :  { %1629 = vrsqrt.f32 %v807_v39  ;;  %v788_v7 = vmax.f32 %v767_v62, 0.0  ;;  %v727_v4 = vmul.f32 0.0012755102, %v557_v19  ;;  %v752_v62 = vmul.f32 %v2696_v27, %v2696_v27 }
  0xed   :  { %v766_v34 = vsub.f32 %v724_v22, %v745_v8  ;;  %v753_v31 = vmul.f32 %v2702_v48, %v2702_v48 }
  0xee   :  { %v548_v24 = vpop.xlane.xlu0 %547  ;;  %v809_v52 = vadd.f32 1e-05, %v788_v7  ;;  %v769_v56 = vsub.f32 %v727_v4, %v748_v42 }
  0xef   :  { %v787_v30 = vmax.f32 %v766_v34, 0.0  ;;  %v726_v18 = vmul.f32 0.0012755102, %v548_v24  ;;  %v575_v51 = vpop.xlane.xlu1 %574  ;;  %v2714_v34 = vmul.f32 0.0012755102, %v2639_v28 }
  0xf0   :  { %v729_v36 = vmul.f32 0.0012755102, %v575_v51  ;;  %v790_v20 = vmax.f32 %v769_v56, 0.0  ;;  %v2724_v28 = vmul.f32 0.0012755102, %v2643_v43 }
  0xf1   :  { %v808_v3 = vadd.f32 1e-05, %v787_v30  ;;  %v768_v57 = vsub.f32 %v726_v18, %v747_v17  ;;  %v851_v17 = vld [vmem:[%s3589_s1 + $0x10] sm:$0xff] }
  0xf2   :  { %v566_v23 = vpop.xlane.xlu0 %565  ;;  %v771_v26 = vsub.f32 %v729_v36, %v750_v53  ;;  %v811_v25 = vadd.f32 1e-05, %v790_v20 }
  0xf3   :  { %1631 = vrsqrt.f32 %v808_v3  ;;  %v789_v59 = vmax.f32 %v768_v57, 0.0  ;;  %v728_v35 = vmul.f32 0.0012755102, %v566_v23  ;;  %v593_v29 = vpop.xlane.xlu1 %592  ;;  %v2721_v3 = vmul.f32 0.0012755102, %v2637_v38 }
  0xf4   :  { %1633 = vrsqrt.f32 %v809_v52  ;;  %v792_v63 = vmax.f32 %v771_v26, 0.0  ;;  %v731_v8 = vmul.f32 0.0012755102, %v593_v29  ;;  %v754_v23 = vmul.f32 %v2714_v34, %v2714_v34  ;;  %v853_v26 = vld [vmem:[%s3589_s1 + $0x20] sm:$0xff] }
  0xf5   :  { %v810_v1 = vadd.f32 1e-05, %v789_v59  ;;  %v770_v40 = vsub.f32 %v728_v35, %v749_v11  ;;  %v852_v59 = vld [vmem:[%s3589_s1 + $0x18] sm:$0xff]  ;;  %v756_v29 = vmul.f32 %v2724_v28, %v2724_v28 }
  0xf6   :  { %v1630_v46 = vpop.eup %1629  ;;  %v584_v13 = vpop.xlane.xlu0 %583  ;;  %v813_v24 = vadd.f32 1e-05, %v792_v63  ;;  %v773_v42 = vsub.f32 %v731_v8, %v752_v62  ;;  %v2760_v62 = vmul.f32 0.0012755102, %v2651_v54  ;;  %v858_v54 = vld [vmem:[%s3589_s1 + $0x48] sm:$0xff] }
  0xf7   :  { %v2693_v49 = vmul.f32 %v1630_v46, %v849_v12  ;;  %1635 = vrsqrt.f32 %v810_v1  ;;  %v791_v45 = vmax.f32 %v770_v40, 0.0  ;;  %v730_v9 = vmul.f32 0.0012755102, %v584_v13 }
  0xf8   :  { %1637 = vrsqrt.f32 %v811_v25  ;;  %v794_v35 = vmax.f32 %v773_v42, 0.0  ;;  %v755_v40 = vmul.f32 %v2721_v3, %v2721_v3  ;;  %v2741_v13 = vmul.f32 0.0012755102, %v2647_v6 }
  0xf9   :  { %956 = vperm.xlu0 %1627, %v2693_v49   ;;  %v611_v44 = vpop.xlane.xlu1 %610  ;;  %v812_v39 = vadd.f32 1e-05, %v791_v45  ;;  %v772_v33 = vsub.f32 %v730_v9, %v751_v15  ;;  %v2747_v25 = vmul.f32 0.0012755102, %v2641_v58  ;;  %v854_v58 = vld [vmem:[%s3589_s1 + $0x28] sm:$0xff] }
  0xfa   :  { %v733_v18 = vmul.f32 0.0012755102, %v611_v44  ;;  %v815_v44 = vadd.f32 1e-05, %v794_v35 }
  0xfb   :  { %1639 = vrsqrt.f32 %v812_v39  ;;  %v793_v30 = vmax.f32 %v772_v33, 0.0  ;;  %v758_v39 = vmul.f32 %v2741_v13, %v2741_v13  ;;  %v757_v33 = vmul.f32 %v2747_v25, %v2747_v25 }
  0xfc   :  { %1641 = vrsqrt.f32 %v813_v24  ;;  %v775_v20 = vsub.f32 %v733_v18, %v754_v23  ;;  %v760_v23 = vmul.f32 %v2760_v62, %v2760_v62 }
  0xfd   :  { %v1632_v47 = vpop.eup %1631  ;;  %v602_v22 = vpop.xlane.xlu0 %601  ;;  %v814_v38 = vadd.f32 1e-05, %v793_v30 }
  0xfe   :  { %v2709_v19 = vmul.f32 %v1632_v47, %v850_v5  ;;  %v1634_v7 = vpop.eup %1633  ;;  %v732_v4 = vmul.f32 0.0012755102, %v602_v22  ;;  %v796_v5 = vmax.f32 %v775_v20, 0.0 }
  0xff   :  { %v2726_v56 = vmul.f32 %v1634_v7, %v851_v17 }
 0x100   :  { %961 = vperm.xlu1 %1628, %v2709_v19   ;;  %v774_v51 = vsub.f32 %v732_v4, %v753_v31  ;;  %v629_v52 = vpop.xlane.xlu1 %628  ;;  %v817_v4 = vadd.f32 1e-05, %v796_v5  ;;  %v860_v5 = vld [vmem:[%s3589_s1 + $0x58] sm:$0xff] }
 0x101   :  { %v1636_v57 = vpop.eup %1635  ;;  %v735_v36 = vmul.f32 0.0012755102, %v629_v52  ;;  %v855_v52 = vld [vmem:[%s3589_s1 + $0x30] sm:$0xff] }
 0x102   :  { %v795_v11 = vmax.f32 %v774_v51, 0.0  ;;  %v2738_v53 = vmul.f32 %v1636_v57, %v852_v59  ;;  %v1638_v46 = vpop.eup %1637  ;;  %v2772_v57 = vmul.f32 0.0012755102, %v2645_v10  ;;  %v2782_v10 = vmul.f32 0.0012755102, %v2657_v37 }
 0x103   :  { %v777_v45 = vsub.f32 %v735_v36, %v756_v29  ;;  %v2750_v6 = vmul.f32 %v1638_v46, %v853_v26  ;;  %v856_v46 = vld [vmem:[%s3589_s1 + $0x38] sm:$0xff] }
 0x104   :  { %966 = vperm.xlu1 %1628, %v2726_v56   ;;  %v816_v43 = vadd.f32 1e-05, %v795_v11  ;;  %v620_v1 = vpop.xlane.xlu0 %619  ;;  %v759_v26 = vmul.f32 %v2772_v57, %v2772_v57 }
 0x105   :  { %v734_v12 = vmul.f32 0.0012755102, %v620_v1  ;;  %v1640_v47 = vpop.eup %1639  ;;  %v798_v22 = vmax.f32 %v777_v45, 0.0 }
 0x106   :  { %1643 = vrsqrt.f32 %v816_v43  ;;  %v2763_v42 = vmul.f32 %v1640_v47, %v854_v58  ;;  %v1642_v30 = vpop.eup %1641  ;;  %v2797_v47 = vmul.f32 0.0012755102, %v2649_v14  ;;  %v2808_v14 = vmul.f32 0.0012755102, %v2665_v32 }
 0x107   :  { %v776_v9 = vsub.f32 %v734_v12, %v755_v40  ;;  %v647_v15 = vpop.xlane.xlu1 %646  ;;  %1645 = vrsqrt.f32 %v814_v38  ;;  %v819_v11 = vadd.f32 1e-05, %v798_v22  ;;  %v2779_v1 = vmul.f32 %v1642_v30, %v855_v52 }
 0x108   :  { %971 = vperm.xlu1 %1628, %v2738_v53   ;;  %v737_v63 = vmul.f32 0.0012755102, %v647_v15  ;;  %1647 = vrsqrt.f32 %v815_v44 }
 0x109   :  { %v797_v8 = vmax.f32 %v776_v9, 0.0 }
 0x10a   :  { %v779_v17 = vsub.f32 %v737_v63, %v758_v39  ;;  %v762_v39 = vmul.f32 %v2782_v10, %v2782_v10 }
 0x10b   :  { %v818_v7 = vadd.f32 1e-05, %v797_v8  ;;  %v638_v31 = vpop.xlane.xlu0 %637 }
 0x10c   :  { %976 = vperm.xlu1 %1628, %v2750_v6   ;;  %v736_v24 = vmul.f32 0.0012755102, %v638_v31  ;;  %v800_v36 = vmax.f32 %v779_v17, 0.0 }
 0x10d   :  { %1649 = vrsqrt.f32 %v818_v7 }
 0x10e   :  { %v778_v18 = vsub.f32 %v736_v24, %v757_v33  ;;  %v665_v51 = vpop.xlane.xlu1 %664  ;;  %1651 = vrsqrt.f32 %v817_v4  ;;  %v821_v9 = vadd.f32 1e-05, %v800_v36  ;;  %v857_v33 = vld [vmem:[%s3589_s1 + $0x40] sm:$0xff]  ;;  %v862_v36 = vld [vmem:[%s3589_s1 + $0x68] sm:$0xff] }
 0x10f   :  { %v739_v59 = vmul.f32 0.0012755102, %v665_v51  ;;  %1653 = vrsqrt.f32 %v819_v11  ;;  %v859_v11 = vld [vmem:[%s3589_s1 + $0x50] sm:$0xff] }
 0x110   :  { %981 = vperm.xlu1 %1628, %v2763_v42   ;;  %v1644_v35 = vpop.eup %1643  ;;  %v799_v38 = vmax.f32 %v778_v18, 0.0 }
 0x111   :  { %v781_v20 = vsub.f32 %v739_v59, %v760_v23  ;;  %v2777_v43 = vmul.f32 %v1644_v35, %v858_v54  ;;  %v1646_v40 = vpop.eup %1645  ;;  %v761_v54 = vmul.f32 %v2797_v47, %v2797_v47 }
 0x112   :  { %v820_v29 = vadd.f32 1e-05, %v799_v38  ;;  %v656_v12 = vpop.xlane.xlu0 %655  ;;  %v2794_v63 = vmul.f32 %v1646_v40, %v856_v46  ;;  %v1648_v8 = vpop.eup %1647  ;;  %v764_v40 = vmul.f32 %v2808_v14, %v2808_v14 }
 0x113   :  { %v738_v45 = vmul.f32 0.0012755102, %v656_v12  ;;  %1001 = vperm.xlu0 %1627, %v2777_v43   ;;  %v802_v15 = vmax.f32 %v781_v20, 0.0  ;;  %v2810_v18 = vmul.f32 %v1648_v8, %v857_v33  ;;  %v2823_v20 = vmul.f32 0.0012755102, %v2653_v55  ;;  %v863_v33 = vld [vmem:[%s3589_s1 + $0x70] sm:$0xff] }
 0x114   :  { %986 = vperm.xlu1 %1628, %v2779_v1   ;;  %1655 = vrsqrt.f32 %v820_v29 }
 0x115   :  { %v780_v37 = vsub.f32 %v738_v45, %v759_v26  ;;  %v683_v44 = vpop.xlane.xlu1 %682  ;;  %1657 = vrsqrt.f32 %v821_v9  ;;  %v823_v31 = vadd.f32 1e-05, %v802_v15  ;;  %v861_v45 = vld [vmem:[%s3589_s1 + $0x60] sm:$0xff] }
 0x116   :  { %v741_v58 = vmul.f32 0.0012755102, %v683_v44  ;;  %v763_v44 = vmul.f32 %v2823_v20, %v2823_v20 }
 0x117   :  { %v1650_v22 = vpop.eup %1649  ;;  %v801_v7 = vmax.f32 %v780_v37, 0.0 }
 0x118   :  { %991 = vperm.xlu1 %1628, %v2794_v63   ;;  %v783_v4 = vsub.f32 %v741_v58, %v762_v39  ;;  %v2805_v17 = vmul.f32 %v1650_v22, %v860_v5  ;;  %v1652_v51 = vpop.eup %1651 }
 0x119   :  { %v822_v24 = vadd.f32 1e-05, %v801_v7  ;;  %v674_v30 = vpop.xlane.xlu0 %673  ;;  %v1654_v38 = vpop.eup %1653  ;;  %v2827_v12 = vmul.f32 %v1652_v51, %v859_v11 }
 0x11a   :  { %v804_v52 = vmax.f32 %v783_v4, 0.0  ;;  %v740_v23 = vmul.f32 0.0012755102, %v674_v30  ;;  %1011 = vperm.xlu0 %1627, %v2805_v17   ;;  %v2838_v39 = vmul.f32 %v1654_v38, %v861_v45 }
 0x11b   :  { %1659 = vrsqrt.f32 %v822_v24 }
 0x11c   :  { %996 = vperm.xlu1 %1628, %v2810_v18   ;;  %1661 = vrsqrt.f32 %v823_v31  ;;  %v825_v32 = vadd.f32 1e-05, %v804_v52  ;;  %v782_v59 = vsub.f32 %v740_v23, %v761_v54  ;;  %v701_v35 = vpop.xlane.xlu1 %700  ;;  %v864_v31 = vld [vmem:[%s3589_s1 + $0x78] sm:$0xff]  ;;  %v865_v52 = vld [vmem:[%s3589_s1 + $0x80] sm:$0xff] }
 0x11d   :  { %v743_v29 = vmul.f32 0.0012755102, %v701_v35  ;;  %v867_v35 = vld [vmem:[%s3589_s1 + $0x90] sm:$0xff] }
 0x11e   :  { %v1656_v46 = vpop.eup %1655  ;;  %v803_v26 = vmax.f32 %v782_v59, 0.0  ;;  %1663 = vrsqrt.f32 %v825_v32  ;;  %v866_v59 = vld [vmem:[%s3589_s1 + $0x88] sm:$0xff] }
 0x11f   :  { %v785_v9 = vsub.f32 %v743_v29, %v764_v40  ;;  %v2832_v15 = vmul.f32 %v1656_v46, %v862_v36  ;;  %v1658_v58 = vpop.eup %1657  ;;  %v869_v29 = vld [vmem:[%s3589_s1 + $0xa0] sm:$0xff] }
 0x120   :  { %1006 = vperm.xlu1 %1628, %v2827_v12   ;;  %v824_v55 = vadd.f32 1e-05, %v803_v26  ;;  %v692_v37 = vpop.xlane.xlu0 %691  ;;  %v2847_v30 = vmul.f32 %v1658_v58, %v863_v33  ;;  %v868_v26 = vld [vmem:[%s3589_s1 + $0x98] sm:$0xff] }
 0x121   :  { %v806_v5 = vmax.f32 %v785_v9, 0.0  ;;  %v742_v8 = vmul.f32 0.0012755102, %v692_v37  ;;  %1021 = vperm.xlu0 %1627, %v2832_v15   ;;  %v913_v9 = vmul.f32 %v2709_v19, %v2663_v60  ;;  %v915_v60 = vmul.f32 %v2738_v53, %v2669_v50  ;;  %v894_v19 = vld [vmem:[%s3590_s2 + $0x18] sm:$0xff]  ;;  %v896_v50 = vld [vmem:[%s3590_s2 + $0x28] sm:$0xff] }
 0x122   :  { %1665 = vrsqrt.f32 %v824_v55  ;;  %v892_v55 = vld [vmem:[%s3590_s2 + $0x8] sm:$0xff] }
 0x123   :  { %v827_v22 = vadd.f32 1e-05, %v806_v5  ;;  %v784_v7 = vsub.f32 %v742_v8, %v763_v44  ;;  %v912_v5 = vmul.f32 %v2693_v49, %v2655_v41  ;;  %v891_v8 = vld [vmem:[%s3590_s2] sm:$0xff]  ;;  %v934_v58 = vsub.f32 %v892_v55, %v913_v9  ;;  %v893_v41 = vld [vmem:[%s3590_s2 + $0x10] sm:$0xff] }
 0x124   :  { %1016 = vperm.xlu1 %1628, %v2838_v39   ;;  %v936_v49 = vsub.f32 %v894_v19, %v915_v60 }
 0x125   :  { %v1660_v4 = vpop.eup %1659  ;;  %1667 = vrsqrt.f32 %v827_v22  ;;  %v805_v24 = vmax.f32 %v784_v7, 0.0  ;;  %v933_v33 = vsub.f32 %v891_v8, %v912_v5  ;;  %v914_v22 = vmul.f32 %v2726_v56, %v2659_v0  ;;  %v895_v0 = vld [vmem:[%s3590_s2 + $0x20] sm:$0xff] }
 0x126   :  { %v1662_v51 = vpop.eup %1661  ;;  %v2849_v54 = vmul.f32 %v1660_v4, %v864_v31  ;;  %v917_v7 = vmul.f32 %v2763_v42, %v2677_v16  ;;  %v916_v31 = vmul.f32 %v2750_v6, %v2673_v2  ;;  %v919_v4 = vmul.f32 %v2794_v63, %v2691_v21  ;;  %v898_v16 = vld [vmem:[%s3590_s2 + $0x38] sm:$0xff]  ;;  %v897_v2 = vld [vmem:[%s3590_s2 + $0x30] sm:$0xff]  ;;  %v900_v21 = vld [vmem:[%s3590_s2 + $0x48] sm:$0xff] }
 0x127   :  { %v826_v23 = vadd.f32 1e-05, %v805_v24  ;;  %v2856_v11 = vmul.f32 %v1662_v51, %v865_v52  ;;  %v935_v53 = vsub.f32 %v893_v41, %v914_v22  ;;  %v918_v24 = vmul.f32 %v2779_v1, %v2681_v61  ;;  %v899_v61 = vld [vmem:[%s3590_s2 + $0x40] sm:$0xff] }
 0x128   :  { %1026 = vperm.xlu1 %1628, %v2847_v30   ;;  %1031 = vperm.xlu0 %1627, %v2849_v54   ;;  %v1664_v32 = vpop.eup %1663  ;;  %v938_v56 = vsub.f32 %v896_v50, %v917_v7  ;;  %v937_v42 = vsub.f32 %v895_v0, %v916_v31  ;;  %v940_v6 = vsub.f32 %v898_v16, %v919_v4  ;;  %v1673_v50 = vld [vmem:[#allocation2 + $0x10] sm:$0xff]  ;;  %v1674_v31 = vld [vmem:[#allocation2 + $0x18] sm:$0xff] }
 0x129   :  { %1669 = vrsqrt.f32 %v826_v23  ;;  %v2867_v40 = vmul.f32 %v1664_v32, %v867_v35  ;;  %v921_v51 = vmul.f32 %v2777_v43, %v2702_v48  ;;  %v939_v63 = vsub.f32 %v897_v2, %v918_v24  ;;  %v902_v48 = vld [vmem:[%s3590_s2 + $0x58] sm:$0xff]  ;;  %v1677_v2 = vld [vmem:[#allocation2 + $0x30] sm:$0xff] }
 0x12a   :  { %v920_v52 = vmul.f32 %v2810_v18, %v2696_v27  ;;  %v923_v23 = vmul.f32 %v2805_v17, %v2721_v3  ;;  %v922_v32 = vmul.f32 %v2827_v12, %v2714_v34  ;;  %v901_v27 = vld [vmem:[%s3590_s2 + $0x50] sm:$0xff]  ;;  %v904_v3 = vld [vmem:[%s3590_s2 + $0x68] sm:$0xff]  ;;  %v924_v35 = vmul.f32 %v2838_v39, %v2724_v28  ;;  %v903_v34 = vld [vmem:[%s3590_s2 + $0x60] sm:$0xff] }
 0x12b   :  { %v942_v1 = vsub.f32 %v900_v21, %v921_v51  ;;  %v905_v28 = vld [vmem:[%s3590_s2 + $0x70] sm:$0xff]  ;;  %v930_v55 = vmul.f32 %v2867_v40, %v2782_v10  ;;  %v1678_v51 = vld [vmem:[#allocation2 + $0x38] sm:$0xff] }
 0x12c   :  { %1036 = vperm.xlu1 %1628, %v2856_v11   ;;  %v1666_v36 = vpop.eup %1665  ;;  %v941_v43 = vsub.f32 %v899_v61, %v920_v52  ;;  %v944_v18 = vsub.f32 %v902_v48, %v923_v23  ;;  %v943_v17 = vsub.f32 %v901_v27, %v922_v32  ;;  %v1680_v61 = vld [vmem:[#allocation2 + $0x48] sm:$0xff]  ;;  %v1681_v23 = vld [vmem:[#allocation2 + $0x50] sm:$0xff]  ;;  %v1683_v27 = vld [vmem:[#allocation2 + $0x60] sm:$0xff] }
 0x12d   :  { %v2865_v38 = vmul.f32 %v1666_v36, %v866_v59  ;;  %v925_v59 = vmul.f32 %v2832_v15, %v2747_v25  ;;  %v927_v36 = vmul.f32 %v2849_v54, %v2772_v57  ;;  %v906_v25 = vld [vmem:[%s3590_s2 + $0x78] sm:$0xff]  ;;  %v945_v15 = vsub.f32 %v903_v34, %v924_v35  ;;  %v908_v57 = vld [vmem:[%s3590_s2 + $0x88] sm:$0xff] }
 0x12e   :  { %v1686_v34 = vld [vmem:[#allocation2 + $0x78] sm:$0xff] }
 0x12f   :  { %v1668_v46 = vpop.eup %1667  ;;  %1041 = vperm.xlu0 %1627, %v2865_v38   ;;  %v946_v12 = vsub.f32 %v904_v3, %v925_v59  ;;  %v948_v39 = vsub.f32 %v906_v25, %v927_v36  ;;  %v1684_v59 = vld [vmem:[#allocation2 + $0x68] sm:$0xff]  ;;  %v1687_v36 = vld [vmem:[#allocation2 + $0x80] sm:$0xff] }
 0x130   :  { %1046 = vperm.xlu1 %1628, %v2867_v40   ;;  %v2877_v45 = vmul.f32 %v1668_v46, %v869_v29  ;;  %v926_v29 = vmul.f32 %v2847_v30, %v2741_v13  ;;  %v929_v46 = vmul.f32 %v2865_v38, %v2797_v47  ;;  %v907_v13 = vld [vmem:[%s3590_s2 + $0x80] sm:$0xff]  ;;  %v910_v47 = vld [vmem:[%s3590_s2 + $0x98] sm:$0xff] }
 0x132   :  { %v947_v54 = vsub.f32 %v905_v28, %v926_v29  ;;  %v950_v30 = vsub.f32 %v908_v57, %v929_v46  ;;  %v1688_v29 = vld [vmem:[#allocation2 + $0x88] sm:$0xff]  ;;  %v1690_v57 = vld [vmem:[#allocation2 + $0x98] sm:$0xff] }
 0x133   :  { %v1670_v37 = vpop.eup %1669 }
 0x134   :  { %1056 = vperm.xlu1 %1628, %v2877_v45   ;;  %v2885_v44 = vmul.f32 %v1670_v37, %v868_v26  ;;  %v928_v26 = vmul.f32 %v2856_v11, %v2760_v62  ;;  %v909_v62 = vld [vmem:[%s3590_s2 + $0x90] sm:$0xff] }
 0x135   :  { %v951_v37 = vsub.f32 %v909_v62, %v930_v55  ;;  %v1694_v62 = vld [vmem:[#allocation2 + $0xb8] sm:$0xff] }
 0x136   :  { %1051 = vperm.xlu0 %1627, %v2885_v44   ;;  %v931_v9 = vmul.f32 %v2885_v44, %v2823_v20  ;;  %v949_v38 = vsub.f32 %v907_v13, %v928_v26  ;;  %v932_v20 = vmul.f32 %v2877_v45, %v2808_v14  ;;  %v911_v44 = vld [vmem:[%s3590_s2 + $0xa0] sm:$0xff]  ;;  %s1870_s2 = smov [#allocation5]  }
 0x137   :  { %v1671_v45 = vld [vmem:[#allocation2] sm:$0xff]  ;;  %s1610_s29 = sshll.u32 %s1870_s2, 4  ;;  %s1611_s29 = int_to_ptr.vmem [resolvable:$true] %s1610_s29 }
 0x138   :  { %1213 = vperm.xlu1 %1628, %v934_v58   ;;  %v952_v11 = vsub.f32 %v910_v47, %v931_v9  ;;  %v953_v5 = vsub.f32 %v911_v44, %v932_v20  ;;  %v1691_v26 = vld [vmem:[#allocation2 + $0xa0] sm:$0xff]  ;;  %v1692_v9 = vld [vmem:[#allocation2 + $0xa8] sm:$0xff]  ;;  %s1840_s30 = scalar_lea.vmem %s1611_s29, 18816  ;;  %p1845_p9 = scmp.lt.s32.totalorder %s1611_s29, %s1611_s29 }
 0x139   :  { %v1696_v44 = vld [vmem:[#allocation2 + $0xc8] sm:$0xff]  ;;  %p1841_p8 = scmp.ne.s32.totalorder %s1611_s29, %s1840_s30  ;;  %p1846_p10 = scmp.lt.s32.totalorder %s1840_s30, %s1840_s30 }
 0x13a   :  { %1208 = vperm.xlu0 %1627, %v933_v33  }
 0x13b   :  { %p1847_p11 = por %p1846_p10, %p1845_p9 }
 0x13c   :  { %1223 = vperm.xlu1 %1628, %v936_v49   ;;  %v1672_v49 = vld [vmem:[#allocation2 + $0x8] sm:$0xff] }
 0x13d   :  { %p1848_p12 = pnand %p1847_p11, %p1841_p8 }
 0x13e   :  { %1218 = vperm.xlu0 %1627, %v935_v53  }
 0x140   :  { %1233 = vperm.xlu1 %1628, %v938_v56   ;;  %v1675_v56 = vld [vmem:[#allocation2 + $0x20] sm:$0xff] }
 0x142   :  { %1228 = vperm.xlu0 %1627, %v937_v42   ;;  %v1676_v42 = vld [vmem:[#allocation2 + $0x28] sm:$0xff] }
 0x144   :  { %1243 = vperm.xlu1 %1628, %v940_v6  }
 0x146   :  { %1238 = vperm.xlu0 %1627, %v939_v63   ;;  %v1679_v63 = vld [vmem:[#allocation2 + $0x40] sm:$0xff] }
 0x148   :  { %1253 = vperm.xlu1 %1628, %v942_v1  }
 0x14a   :  { %1248 = vperm.xlu0 %1627, %v941_v43   ;;  %v1682_v43 = vld [vmem:[#allocation2 + $0x58] sm:$0xff] }
 0x14c   :  { %1263 = vperm.xlu1 %1628, %v944_v18  }
 0x14e   :  { %1258 = vperm.xlu0 %1627, %v943_v17   ;;  %v1685_v17 = vld [vmem:[#allocation2 + $0x70] sm:$0xff] }
 0x150   :  { %1273 = vperm.xlu1 %1628, %v946_v12  }
 0x152   :  { %1268 = vperm.xlu0 %1627, %v945_v15  }
 0x154   :  { %1283 = vperm.xlu1 %1628, %v948_v39   ;;  %v1689_v39 = vld [vmem:[#allocation2 + $0x90] sm:$0xff] }
 0x156   :  { %1278 = vperm.xlu0 %1627, %v947_v54  }
 0x158   :  { %1293 = vperm.xlu1 %1628, %v950_v30  }
 0x15a   :  { %1288 = vperm.xlu0 %1627, %v949_v38   ;;  %v1693_v38 = vld [vmem:[#allocation2 + $0xb0] sm:$0xff] }
 0x15c   :  { %1303 = vperm.xlu1 %1628, %v952_v11  }
 0x15e   :  { %1298 = vperm.xlu0 %1627, %v951_v37   ;;  %v1695_v37 = vld [vmem:[#allocation2 + $0xc0] sm:$0xff] }
 0x162   :  { %1308 = vperm.xlu0 %1627, %v953_v5  }
 0x178   :  { %v957_v33 = vpop.permute.xlu0 %956 }
 0x179   :  { %v3000_v41 = vmul.f32 %v1671_v45, %v957_v33  ;;  %v3002_v7 = vmul.f32 %v1672_v49, %v957_v33  ;;  %v3004_v53 = vmul.f32 %v1673_v50, %v957_v33  ;;  %v3006_v0 = vmul.f32 %v1674_v31, %v957_v33  ;;  %v1699_v49 = vld [vmem:[#allocation2 + $0xe0] sm:$0xff]  ;;  %v1700_v31 = vld [vmem:[#allocation2 + $0xe8] sm:$0xff] }
 0x17a   :  { %v3008_v4 = vmul.f32 %v1675_v56, %v957_v33  ;;  %v3012_v24 = vmul.f32 %v1676_v42, %v957_v33  ;;  %v3014_v6 = vmul.f32 %v1677_v2, %v957_v33  ;;  %v1698_v33 = vld [vmem:[#allocation2 + $0xd8] sm:$0xff]  ;;  %v1701_v42 = vld [vmem:[#allocation2 + $0xf0] sm:$0xff] }
 0x17f   :  { %v962_v8 = vpop.permute.xlu1 %961 }
 0x180   :  { %v3016_v21 = vmul.f32 %v1678_v51, %v962_v8  ;;  %v3018_v52 = vmul.f32 %v1679_v63, %v962_v8  ;;  %v3020_v1 = vmul.f32 %v1680_v61, %v962_v8  ;;  %v3022_v48 = vmul.f32 %v1681_v23, %v962_v8  ;;  %v1702_v51 = vld [vmem:[#allocation2 + $0xf8] sm:$0xff]  ;;  %v1703_v61 = vld [vmem:[#allocation2 + $0x100] sm:$0xff]  ;;  %v1704_v23 = vld [vmem:[#allocation2 + $0x108] sm:$0xff] }
 0x181   :  { %v3024_v32 = vmul.f32 %v1682_v43, %v962_v8  ;;  %v3026_v18 = vmul.f32 %v1683_v27, %v962_v8  ;;  %v3028_v3 = vmul.f32 %v1684_v59, %v962_v8  ;;  %v1697_v8 = vld [vmem:[#allocation2 + $0xd0] sm:$0xff] }
 0x182   :  { %v1705_v27 = vld [vmem:[#allocation2 + $0x110] sm:$0xff] }
 0x183   :  { %v967_v10 = vpop.permute.xlu1 %966 }
 0x184   :  { %v3030_v35 = vmul.f32 %v1685_v17, %v967_v10  ;;  %v3032_v12 = vmul.f32 %v1686_v34, %v967_v10  ;;  %v3034_v25 = vmul.f32 %v1687_v36, %v967_v10  ;;  %v3038_v28 = vmul.f32 %v1688_v29, %v967_v10  ;;  %v1706_v17 = vld [vmem:[#allocation2 + $0x118] sm:$0xff]  ;;  %v1707_v36 = vld [vmem:[#allocation2 + $0x120] sm:$0xff] }
 0x185   :  { %v3040_v46 = vmul.f32 %v1689_v39, %v967_v10  ;;  %v3042_v54 = vmul.f32 %v1690_v57, %v967_v10  ;;  %v3044_v13 = vmul.f32 %v1691_v26, %v967_v10  ;;  %v1708_v57 = vld [vmem:[#allocation2 + $0x128] sm:$0xff] }
 0x187   :  { %v2988_v40 = vpop.permute.xlu1 %971 }
 0x188   :  { %v3049_v47 = vmul.f32 %v1692_v9, %v2988_v40  ;;  %v3052_v55 = vmul.f32 %v1693_v38, %v2988_v40  ;;  %v3055_v11 = vmul.f32 %v1694_v62, %v2988_v40  ;;  %v3058_v20 = vmul.f32 %v1695_v37, %v2988_v40  ;;  %v1709_v9 = vld [vmem:[#allocation2 + $0x130] sm:$0xff]  ;;  %v1711_v37 = vld [vmem:[#allocation2 + $0x140] sm:$0xff] }
 0x189   :  { %v3061_v5 = vmul.f32 %v1696_v44, %v2988_v40  ;;  %v3064_v10 = vmul.f32 %v1697_v8, %v2988_v40  ;;  %v3067_v45 = vmul.f32 %v1698_v33, %v2988_v40  ;;  %v1712_v33 = vld [vmem:[#allocation2 + $0x148] sm:$0xff] }
 0x18b   :  { %v2990_v58 = vpop.permute.xlu1 %976 }
 0x18c   :  { %v3070_v50 = vmul.f32 %v1699_v49, %v2990_v58  ;;  %v3073_v56 = vmul.f32 %v1700_v31, %v2990_v58  ;;  %v3076_v2 = vmul.f32 %v1701_v42, %v2990_v58  ;;  %v3079_v63 = vmul.f32 %v1702_v51, %v2990_v58  ;;  %v1713_v31 = vld [vmem:[#allocation2 + $0x1f8] sm:$0xff]  ;;  %v1714_v51 = vld [vmem:[#allocation2 + $0x200] sm:$0xff] }
 0x18d   :  { %v3082_v40 = vmul.f32 %v1703_v61, %v2990_v58  ;;  %v3085_v43 = vmul.f32 %v1704_v23, %v2990_v58  ;;  %v3088_v59 = vmul.f32 %v1705_v27, %v2990_v58  ;;  %v1710_v58 = vld [vmem:[#allocation2 + $0x138] sm:$0xff]  ;;  %v1715_v23 = vld [vmem:[#allocation2 + $0x208] sm:$0xff] }
 0x18f   :  { %v2992_v60 = vpop.permute.xlu1 %981 }
 0x190   :  { %v3091_v34 = vmul.f32 %v1706_v17, %v2992_v60  ;;  %v3094_v29 = vmul.f32 %v1707_v36, %v2992_v60  ;;  %v3099_v26 = vmul.f32 %v1708_v57, %v2992_v60  ;;  %v3102_v38 = vmul.f32 %v1709_v9, %v2992_v60  ;;  %v1716_v17 = vld [vmem:[#allocation2 + $0x210] sm:$0xff]  ;;  %v1717_v57 = vld [vmem:[#allocation2 + $0x218] sm:$0xff]  ;;  %v1718_v9 = vld [vmem:[#allocation2 + $0x220] sm:$0xff] }
 0x191   :  { %v3105_v62 = vmul.f32 %v1710_v58, %v2992_v60  ;;  %v3108_v44 = vmul.f32 %v1711_v37, %v2992_v60  ;;  %v3113_v49 = vmul.f32 %v1712_v33, %v2992_v60  ;;  %v1719_v37 = vld [vmem:[#allocation2 + $0x228] sm:$0xff] }
 0x192   :  { %v2998_v14 = vpop.permute.xlu0 %1001 }
 0x193   :  { %v2994_v19 = vpop.permute.xlu1 %986  ;;  %v3116_v42 = vmul.f32 %v1713_v31, %v2998_v14  ;;  %v3119_v61 = vmul.f32 %v1714_v51, %v2998_v14  ;;  %v3122_v27 = vmul.f32 %v1715_v23, %v2998_v14  ;;  %v3125_v36 = vmul.f32 %v1716_v17, %v2998_v14  ;;  %v1720_v31 = vld [vmem:[#allocation2 + $0x150] sm:$0xff]  ;;  %v1721_v23 = vld [vmem:[#allocation2 + $0x158] sm:$0xff] }
 0x194   :  { %v3128_v60 = vmul.f32 %v1717_v57, %v2998_v14  ;;  %v3131_v58 = vmul.f32 %v1718_v9, %v2998_v14  ;;  %v3134_v33 = vmul.f32 %v1719_v37, %v2998_v14  ;;  %v3137_v51 = vmul.f32 %v1720_v31, %v2994_v19  ;;  %v1724_v14 = vld [vmem:[#allocation2 + $0x170] sm:$0xff]  ;;  %v1725_v31 = vld [vmem:[#allocation2 + $0x178] sm:$0xff] }
 0x195   :  { %3820 = vst [vmem:[#allocation8_spill] sm:$0xff] %v3116_v42  ;;  %3821 = vst [vmem:[#allocation9_spill] sm:$0xff] %v3119_v61  ;;  %v3140_v17 = vmul.f32 %v1721_v23, %v2994_v19  ;;  %v3151_v37 = vmul.f32 %v1724_v14, %v2994_v19  ;;  %v1726_v23 = vld [vmem:[#allocation2 + $0x180] sm:$0xff] }
 0x196   :  { %3822 = vst [vmem:[#allocation29_spill] sm:$0xff] %v3122_v27  ;;  %3823 = vst [vmem:[#allocation22_spill] sm:$0xff] %v3125_v36  ;;  %v1722_v36 = vld [vmem:[#allocation2 + $0x160] sm:$0xff]  ;;  %v3157_v27 = vmul.f32 %v1726_v23, %v2994_v19  ;;  %v1732_v23 = vld [vmem:[#allocation2 + $0x268] sm:$0xff] }
 0x197   :  { %v2996_v22 = vpop.permute.xlu1 %991  ;;  %3824 = vst [vmem:[#allocation10_spill] sm:$0xff] %v3128_v60  ;;  %3825 = vst [vmem:[#allocation11_spill] sm:$0xff] %v3131_v58  ;;  %v3143_v57 = vmul.f32 %v1722_v36, %v2994_v19  ;;  %v1723_v60 = vld [vmem:[#allocation2 + $0x168] sm:$0xff] }
 0x198   :  { %3826 = vst [vmem:[#allocation27_spill] sm:$0xff] %v3134_v33  ;;  %3827 = vst [vmem:[#allocation12_spill] sm:$0xff] %v3137_v51  ;;  %v3146_v9 = vmul.f32 %v1723_v60, %v2994_v19  ;;  %v3154_v33 = vmul.f32 %v1725_v31, %v2994_v19  ;;  %v1727_v36 = vld [vmem:[#allocation2 + $0x188] sm:$0xff]  ;;  %v1728_v60 = vld [vmem:[#allocation2 + $0x190] sm:$0xff] }
 0x199   :  { %v3036_v15 = vpop.permute.xlu0 %1011  ;;  %3828 = vst [vmem:[#allocation13_spill] sm:$0xff] %v3140_v17  ;;  %3829 = vst [vmem:[#allocation31_spill] sm:$0xff] %v3143_v57  ;;  %v3160_v61 = vmul.f32 %v1727_v36, %v2996_v22  ;;  %v3163_v42 = vmul.f32 %v1728_v60, %v2996_v22  ;;  %v1734_v57 = vld [vmem:[#allocation2 + $0x1b0] sm:$0xff]  ;;  %v1735_v17 = vld [vmem:[#allocation2 + $0x1b8] sm:$0xff] }
 0x19a   :  { %3830 = vst [vmem:[#allocation14_spill] sm:$0xff] %v3146_v9  ;;  %3831 = vst [vmem:[#allocation33_spill] sm:$0xff] %v3151_v37  ;;  %v1729_v9 = vld [vmem:[#allocation2 + $0x198] sm:$0xff]  ;;  %v1730_v37 = vld [vmem:[#allocation2 + $0x1a0] sm:$0xff]  ;;  %v3175_v36 = vmul.f32 %v1732_v23, %v3036_v15 }
 0x19b   :  { %v3010_v16 = vpop.permute.xlu1 %996  ;;  %3832 = vst [vmem:[#allocation34_spill] sm:$0xff] %v3154_v33  ;;  %3833 = vst [vmem:[#allocation15_spill] sm:$0xff] %v3157_v27  ;;  %v3166_v14 = vmul.f32 %v1729_v9, %v2996_v22  ;;  %v3169_v31 = vmul.f32 %v1730_v37, %v2996_v22  ;;  %v1731_v33 = vld [vmem:[#allocation2 + $0x1a8] sm:$0xff]  ;;  %v1733_v27 = vld [vmem:[#allocation2 + $0x270] sm:$0xff]  ;;  %v3181_v9 = vmul.f32 %v1734_v57, %v2996_v22 }
 0x19c   :  { %v3172_v19 = vmul.f32 %v1731_v33, %v2996_v22  ;;  %3836 = vst [vmem:[#allocation37_spill] sm:$0xff] %v3175_v36  ;;  %v3178_v60 = vmul.f32 %v1733_v27, %v3036_v15  ;;  %v3184_v37 = vmul.f32 %v1735_v17, %v2996_v22  ;;  %v1736_v33 = vld [vmem:[#allocation2 + $0x278] sm:$0xff]  ;;  %v1737_v23 = vld [vmem:[#allocation2 + $0x280] sm:$0xff]  ;;  %v1738_v27 = vld [vmem:[#allocation2 + $0x288] sm:$0xff] }
 0x19d   :  { %3834 = vst [vmem:[#allocation16_spill] sm:$0xff] %v3169_v31  ;;  %3838 = vst [vmem:[#allocation18_spill] sm:$0xff] %v3181_v9  ;;  %v3192_v36 = vmul.f32 %v1737_v23, %v3036_v15  ;;  %v1739_v57 = vld [vmem:[#allocation2 + $0x290] sm:$0xff]  ;;  %v1740_v17 = vld [vmem:[#allocation2 + $0x298] sm:$0xff] }
 0x19e   :  { %3835 = vst [vmem:[#allocation36_spill] sm:$0xff] %v3172_v19  ;;  %3837 = vst [vmem:[#allocation17_spill] sm:$0xff] %v3178_v60  ;;  %v3189_v19 = vmul.f32 %v1736_v33, %v3036_v15  ;;  %v3195_v60 = vmul.f32 %v1738_v27, %v3036_v15  ;;  %v3198_v9 = vmul.f32 %v1739_v57, %v3036_v15  ;;  %v1741_v33 = vld [vmem:[#allocation2 + $0x1c0] sm:$0xff]  ;;  %v1742_v23 = vld [vmem:[#allocation2 + $0x1c8] sm:$0xff] }
 0x19f   :  { %v3046_v30 = vpop.permute.xlu1 %1006  ;;  %3839 = vst [vmem:[#allocation19_spill] sm:$0xff] %v3184_v37  ;;  %3841 = vst [vmem:[#allocation21_spill] sm:$0xff] %v3192_v36  ;;  %v3203_v37 = vmul.f32 %v1740_v17, %v3036_v15  ;;  %v3209_v36 = vmul.f32 %v1742_v23, %v3010_v16  ;;  %v1743_v27 = vld [vmem:[#allocation2 + $0x1d0] sm:$0xff]  ;;  %v1744_v57 = vld [vmem:[#allocation2 + $0x1d8] sm:$0xff] }
 0x1a0   :  { %v3110_v8 = vpop.permute.xlu0 %1021  ;;  %3840 = vst [vmem:[#allocation20_spill] sm:$0xff] %v3189_v19  ;;  %3842 = vst [vmem:[#allocation43_spill] sm:$0xff] %v3195_v60  ;;  %v3206_v19 = vmul.f32 %v1741_v33, %v3010_v16  ;;  %v3212_v60 = vmul.f32 %v1743_v27, %v3010_v16  ;;  %v1745_v31 = vld [vmem:[#allocation2 + $0x1e0] sm:$0xff]  ;;  %v1746_v17 = vld [vmem:[#allocation2 + $0x1e8] sm:$0xff] }
 0x1a1   :  { %3843 = vst [vmem:[#allocation46_spill] sm:$0xff] %v3198_v9  ;;  %3844 = vst [vmem:[#allocation23_spill] sm:$0xff] %v3203_v37  ;;  %v3215_v9 = vmul.f32 %v1744_v57, %v3010_v16  ;;  %v3218_v15 = vmul.f32 %v1745_v31, %v3010_v16  ;;  %v3221_v33 = vmul.f32 %v1746_v17, %v3010_v16  ;;  %v1747_v37 = vld [vmem:[#allocation2 + $0x1f0] sm:$0xff] }
 0x1a2   :  { %3845 = vst [vmem:[#allocation26_spill] sm:$0xff] %v3209_v36  ;;  %3846 = vst [vmem:[#allocation48_spill] sm:$0xff] %v3212_v60  ;;  %v3224_v23 = vmul.f32 %v1747_v37, %v3010_v16  ;;  %v1748_v36 = vld [vmem:[#allocation2 + $0x230] sm:$0xff]  ;;  %v1749_v60 = vld [vmem:[#allocation2 + $0x238] sm:$0xff] }
 0x1a3   :  { %v3096_v39 = vpop.permute.xlu1 %1016  ;;  %3847 = vst [vmem:[#allocation50_spill] sm:$0xff] %v3215_v9  ;;  %3848 = vst [vmem:[#allocation24_spill] sm:$0xff] %v3218_v15  ;;  %v3227_v27 = vmul.f32 %v1748_v36, %v3046_v30  ;;  %v3230_v57 = vmul.f32 %v1749_v60, %v3046_v30  ;;  %v1750_v9 = vld [vmem:[#allocation2 + $0x240] sm:$0xff]  ;;  %v1751_v15 = vld [vmem:[#allocation2 + $0x248] sm:$0xff] }
 0x1a4   :  { %3849 = vst [vmem:[#allocation25_spill] sm:$0xff] %v3221_v33  ;;  %3850 = vst [vmem:[#allocation28_spill] sm:$0xff] %v3224_v23  ;;  %v3233_v31 = vmul.f32 %v1750_v9, %v3046_v30  ;;  %v3236_v17 = vmul.f32 %v1751_v15, %v3046_v30  ;;  %v1752_v33 = vld [vmem:[#allocation2 + $0x2d8] sm:$0xff]  ;;  %v1753_v37 = vld [vmem:[#allocation2 + $0x250] sm:$0xff] }
 0x1a5   :  { %3851 = vst [vmem:[#allocation58_spill] sm:$0xff] %v3227_v27  ;;  %3852 = vst [vmem:[#allocation30_spill] sm:$0xff] %v3230_v57  ;;  %v3239_v16 = vmul.f32 %v1752_v33, %v3110_v8  ;;  %v3242_v36 = vmul.f32 %v1753_v37, %v3046_v30  ;;  %v1754_v27 = vld [vmem:[#allocation2 + $0x258] sm:$0xff]  ;;  %v1755_v57 = vld [vmem:[#allocation2 + $0x260] sm:$0xff] }
 0x1a6   :  { %3853 = vst [vmem:[#allocation55_spill] sm:$0xff] %v3233_v31  ;;  %3854 = vst [vmem:[#allocation32_spill] sm:$0xff] %v3236_v17  ;;  %v3245_v60 = vmul.f32 %v1754_v27, %v3046_v30  ;;  %v3248_v9 = vmul.f32 %v1755_v57, %v3046_v30  ;;  %v1756_v15 = vld [vmem:[#allocation2 + $0x2e0] sm:$0xff]  ;;  %v1757_v33 = vld [vmem:[#allocation2 + $0x2e8] sm:$0xff] }
 0x1a7   :  { %v3148_v58 = vpop.permute.xlu1 %1026  ;;  %v3186_v51 = vpop.permute.xlu0 %1031  ;;  %3855 = vst [vmem:[#allocation56_spill] sm:$0xff] %v3239_v16  ;;  %3856 = vst [vmem:[#allocation57_spill] sm:$0xff] %v3242_v36  ;;  %v3253_v17 = vmul.f32 %v1756_v15, %v3110_v8  ;;  %v3256_v16 = vmul.f32 %v1757_v33, %v3110_v8  ;;  %v1758_v37 = vld [vmem:[#allocation2 + $0x2f0] sm:$0xff]  ;;  %v1759_v27 = vld [vmem:[#allocation2 + $0x2f8] sm:$0xff] }
 0x1a8   :  { %3857 = vst [vmem:[#allocation35_spill] sm:$0xff] %v3245_v60  ;;  %3858 = vst [vmem:[#allocation41_spill] sm:$0xff] %v3248_v9  ;;  %v3259_v36 = vmul.f32 %v1758_v37, %v3110_v8  ;;  %v3262_v60 = vmul.f32 %v1759_v27, %v3110_v8  ;;  %v1760_v57 = vld [vmem:[#allocation2 + $0x300] sm:$0xff]  ;;  %v1761_v15 = vld [vmem:[#allocation2 + $0x308] sm:$0xff] }
 0x1a9   :  { %3859 = vst [vmem:[#allocation65_spill] sm:$0xff] %v3253_v17  ;;  %3860 = vst [vmem:[#allocation38_spill] sm:$0xff] %v3256_v16  ;;  %v3267_v9 = vmul.f32 %v1760_v57, %v3110_v8  ;;  %v3270_v17 = vmul.f32 %v1761_v15, %v3110_v8  ;;  %v1762_v33 = vld [vmem:[#allocation2 + $0x2a0] sm:$0xff]  ;;  %v1763_v37 = vld [vmem:[#allocation2 + $0x2a8] sm:$0xff] }
 0x1aa   :  { %3861 = vst [vmem:[#allocation39_spill] sm:$0xff] %v3259_v36  ;;  %3862 = vst [vmem:[#allocation63_spill] sm:$0xff] %v3262_v60  ;;  %v3273_v16 = vmul.f32 %v1762_v33, %v3096_v39  ;;  %v3276_v36 = vmul.f32 %v1763_v37, %v3096_v39  ;;  %v1764_v27 = vld [vmem:[#allocation2 + $0x2b0] sm:$0xff]  ;;  %v1765_v23 = vld [vmem:[#allocation2 + $0x2b8] sm:$0xff] }
 0x1ab   :  { %v3200_v22 = vpop.permute.xlu1 %1036  ;;  %3863 = vst [vmem:[#allocation40_spill] sm:$0xff] %v3267_v9  ;;  %v3279_v60 = vmul.f32 %v1764_v27, %v3096_v39  ;;  %v3282_v57 = vmul.f32 %v1765_v23, %v3096_v39  ;;  %v1766_v9 = vld [vmem:[#allocation2 + $0x2c0] sm:$0xff]  ;;  %v1767_v15 = vld [vmem:[#allocation2 + $0x2c8] sm:$0xff] }
 0x1ac   :  { %3864 = vst [vmem:[#allocation42_spill] sm:$0xff] %v3273_v16  ;;  %3865 = vst [vmem:[#allocation67_spill] sm:$0xff] %v3276_v36  ;;  %v3285_v8 = vmul.f32 %v1766_v9, %v3096_v39  ;;  %v3288_v33 = vmul.f32 %v1767_v15, %v3096_v39  ;;  %v1768_v16 = vld [vmem:[#allocation2 + $0x2d0] sm:$0xff]  ;;  %v1772_v15 = vld [vmem:[#allocation2 + $0x348] sm:$0xff] }
 0x1ad   :  { %3866 = vst [vmem:[#allocation44_spill] sm:$0xff] %v3279_v60  ;;  %3867 = vst [vmem:[#allocation69_spill] sm:$0xff] %v3282_v57  ;;  %v3291_v37 = vmul.f32 %v1768_v16, %v3096_v39  ;;  %v1769_v36 = vld [vmem:[#allocation2 + $0x310] sm:$0xff]  ;;  %v1770_v60 = vld [vmem:[#allocation2 + $0x318] sm:$0xff] }
 0x1ae   :  { %v3264_v30 = vpop.permute.xlu0 %1041  ;;  %3868 = vst [vmem:[#allocation47_spill] sm:$0xff] %v3285_v8  ;;  %3869 = vst [vmem:[#allocation45_spill] sm:$0xff] %v3288_v33  ;;  %v3294_v27 = vmul.f32 %v1769_v36, %v3148_v58  ;;  %v3297_v23 = vmul.f32 %v1770_v60, %v3148_v58  ;;  %v1771_v57 = vld [vmem:[#allocation2 + $0x320] sm:$0xff]  ;;  %v3305_v33 = vmul.f32 %v1772_v15, %v3186_v51  ;;  %v1773_v39 = vld [vmem:[#allocation2 + $0x350] sm:$0xff] }
 0x1af   :  { %v3250_v31 = vpop.permute.xlu1 %1046  ;;  %v3300_v9 = vmul.f32 %v1771_v57, %v3148_v58  ;;  %v3308_v16 = vmul.f32 %v1773_v39, %v3186_v51  ;;  %v1774_v36 = vld [vmem:[#allocation2 + $0x358] sm:$0xff]  ;;  %v1775_v60 = vld [vmem:[#allocation2 + $0x328] sm:$0xff]  ;;  %v1776_v57 = vld [vmem:[#allocation2 + $0x360] sm:$0xff] }
 0x1b0   :  { %3870 = vst [vmem:[#allocation71_spill] sm:$0xff] %v3294_v27  ;;  %3871 = vst [vmem:[#allocation72_spill] sm:$0xff] %v3297_v23  ;;  %v3311_v27 = vmul.f32 %v1774_v36, %v3186_v51  ;;  %v3314_v23 = vmul.f32 %v1775_v60, %v3148_v58  ;;  %v1780_v60 = vld [vmem:[#allocation2 + $0x330] sm:$0xff] }
 0x1b1   :  { %3872 = vst [vmem:[#allocation49_spill] sm:$0xff] %v3300_v9  ;;  %3874 = vst [vmem:[#allocation52_spill] sm:$0xff] %v3305_v33  ;;  %v3317_v9 = vmul.f32 %v1776_v57, %v3186_v51  ;;  %v1778_v33 = vld [vmem:[#allocation2 + $0x370] sm:$0xff]  ;;  %v1781_v57 = vld [vmem:[#allocation2 + $0x338] sm:$0xff] }
 0x1b2   :  { %3875 = vst [vmem:[#allocation53_spill] sm:$0xff] %v3308_v16  ;;  %3876 = vst [vmem:[#allocation79_spill] sm:$0xff] %v3311_v27  ;;  %v3323_v39 = vmul.f32 %v1778_v33, %v3186_v51  ;;  %v1779_v16 = vld [vmem:[#allocation2 + $0x378] sm:$0xff]  ;;  %v1783_v33 = vld [vmem:[#allocation2 + $0x380] sm:$0xff] }
 0x1b3   :  { %v3302_v8 = vpop.permute.xlu1 %1056  ;;  %3877 = vst [vmem:[#allocation59_spill] sm:$0xff] %v3314_v23  ;;  %3878 = vst [vmem:[#allocation54_spill] sm:$0xff] %v3317_v9  ;;  %v3326_v36 = vmul.f32 %v1779_v16, %v3186_v51  ;;  %v3331_v23 = vmul.f32 %v1780_v60, %v3148_v58  ;;  %v3334_v9 = vmul.f32 %v1781_v57, %v3148_v58 }
 0x1b4   :  { %3873 = vst [vmem:[#allocation51_spill] sm:$0xff] %v3302_v8  ;;  %v1777_v8 = vld [vmem:[#allocation2 + $0x368] sm:$0xff]  ;;  %3880 = vst [vmem:[#allocation60_spill] sm:$0xff] %v3323_v39  ;;  %v3340_v39 = vmul.f32 %v1783_v33, %v3200_v22 }
 0x1b5   :  { %v3320_v15 = vmul.f32 %v1777_v8, %v3186_v51  ;;  %3881 = vst [vmem:[#allocation61_spill] sm:$0xff] %v3326_v36  ;;  %v3328_v27 = vpop.permute.xlu0 %1051  ;;  %3882 = vst [vmem:[#allocation64_spill] sm:$0xff] %v3331_v23  ;;  %v1782_v8 = vld [vmem:[#allocation2 + $0x340] sm:$0xff]  ;;  %v1784_v51 = vld [vmem:[#allocation2 + $0x388] sm:$0xff] }
 0x1b6   :  { %3883 = vst [vmem:[#allocation66_spill] sm:$0xff] %v3334_v9  ;;  %3885 = vst [vmem:[#allocation68_spill] sm:$0xff] %v3340_v39  ;;  %v3343_v16 = vmul.f32 %v1784_v51, %v3200_v22  ;;  %v1785_v36 = vld [vmem:[#allocation2 + $0x390] sm:$0xff]  ;;  %v1786_v23 = vld [vmem:[#allocation2 + $0x398] sm:$0xff] }
 0x1b7   :  { %3879 = vst [vmem:[#allocation62_spill] sm:$0xff] %v3320_v15  ;;  %v3337_v15 = vmul.f32 %v1782_v8, %v3148_v58  ;;  %v3346_v60 = vmul.f32 %v1785_v36, %v3200_v22  ;;  %v3349_v57 = vmul.f32 %v1786_v23, %v3200_v22  ;;  %v1787_v9 = vld [vmem:[#allocation2 + $0x3a0] sm:$0xff]  ;;  %v1214_v8 = vpop.permute.xlu1 %1213 }
 0x1b8   :  { %3886 = vst [vmem:[#allocation82_spill] sm:$0xff] %v3343_v16  ;;  %v3352_v58 = vmul.f32 %v1787_v9, %v3200_v22  ;;  %v1318_v33 = vadd.f32 %v1214_v8, %v3016_v21  ;;  %v1319_v39 = vadd.f32 %v1214_v8, %v3018_v52  ;;  %v1320_v51 = vadd.f32 %v1214_v8, %v3020_v1  ;;  %v1790_v21 = vld [vmem:[#allocation2 + $0x3c0] sm:$0xff]  ;;  %v1791_v1 = vld [vmem:[#allocation2 + $0x3c8] sm:$0xff] }
 0x1b9   :  { %3884 = vst [vmem:[#allocation81_spill] sm:$0xff] %v3337_v15  ;;  %3887 = vst [vmem:[#allocation70_spill] sm:$0xff] %v3346_v60  ;;  %v1321_v16 = vadd.f32 %v1214_v8, %v3022_v48  ;;  %v1788_v15 = vld [vmem:[#allocation2 + $0x3a8] sm:$0xff]  ;;  %v1322_v23 = vadd.f32 %v1214_v8, %v3024_v32  ;;  %v1324_v9 = vadd.f32 %v1214_v8, %v3028_v3 }
 0x1ba   :  { %3888 = vst [vmem:[#allocation76_spill] sm:$0xff] %v3349_v57  ;;  %3889 = vst [vmem:[#allocation73_spill] sm:$0xff] %v3352_v58  ;;  %v3359_v36 = vmul.f32 %v1788_v15, %v3200_v22  ;;  %v1323_v57 = vadd.f32 %v1214_v8, %v3026_v18  ;;  %v1789_v58 = vld [vmem:[#allocation2 + $0x3b8] sm:$0xff]  ;;  %v3368_v52 = vmul.f32 %v1790_v21, %v3264_v30  ;;  %v1209_v15 = vpop.permute.xlu0 %1208 }
 0x1bb   :  { %v3365_v60 = vmul.f32 %v1789_v58, %v3264_v30  ;;  %v3371_v48 = vmul.f32 %v1791_v1, %v3264_v30  ;;  %1465 = vst [vmem:[#allocation5 + $0x38] sm:$0xff] %v1318_v33  ;;  %1466 = vst [vmem:[#allocation5 + $0x40] sm:$0xff] %v1319_v39  ;;  %v1311_v18 = vadd.f32 %v1209_v15, %v3000_v41  ;;  %v1224_v21 = vpop.permute.xlu1 %1223  ;;  %v1796_v1 = vld [vmem:[#allocation2 + $0x3e8] sm:$0xff] }
 0x1bc   :  { %3890 = vst [vmem:[#allocation74_spill] sm:$0xff] %v3359_v36  ;;  %v1792_v36 = vld [vmem:[#allocation2 + $0x3b0] sm:$0xff]  ;;  %1467 = vst [vmem:[#allocation5 + $0x48] sm:$0xff] %v1320_v51  ;;  %v1312_v3 = vadd.f32 %v1209_v15, %v3002_v7  ;;  %v1313_v58 = vadd.f32 %v1209_v15, %v3004_v53  ;;  %v1314_v8 = vadd.f32 %v1209_v15, %v3006_v0 }
 0x1bd   :  { %v3374_v32 = vmul.f32 %v1792_v36, %v3200_v22  ;;  %1468 = vst [vmem:[#allocation5 + $0x50] sm:$0xff] %v1321_v16  ;;  %1469 = vst [vmem:[#allocation5 + $0x58] sm:$0xff] %v1322_v23  ;;  %v1315_v22 = vadd.f32 %v1209_v15, %v3008_v4  ;;  %v1316_v33 = vadd.f32 %v1209_v15, %v3012_v24  ;;  %v1794_v24 = vld [vmem:[#allocation2 + $0x3d8] sm:$0xff] }
 0x1be   :  { %1470 = vst [vmem:[#allocation5 + $0x60] sm:$0xff] %v1323_v57  ;;  %1471 = vst.msk [vmem:[#allocation5 + $0x68] sm:$0xff] %vm181_vm0, %v1324_v9  ;;  %v1317_v39 = vadd.f32 %v1209_v15, %v3014_v6  ;;  %v1332_v16 = vadd.f32 %v1224_v21, %v3049_v47  ;;  %v1333_v41 = vadd.f32 %v1224_v21, %v3052_v55  ;;  %v1793_v57 = vld [vmem:[#allocation2 + $0x3d0] sm:$0xff]  ;;  %v1219_v47 = vpop.permute.xlu0 %1218 }
 0x1bf   :  { %1458 = vst [vmem:[#allocation5] sm:$0xff] %v1311_v18  ;;  %1459 = vst [vmem:[#allocation5 + $0x8] sm:$0xff] %v1312_v3  ;;  %v1334_v7 = vadd.f32 %v1224_v21, %v3055_v11  ;;  %v1335_v53 = vadd.f32 %v1224_v21, %v3058_v20  ;;  %v1336_v0 = vadd.f32 %v1224_v21, %v3061_v5  ;;  %v1234_v23 = vpop.permute.xlu1 %1233 }
 0x1c0   :  { %1460 = vst [vmem:[#allocation5 + $0x10] sm:$0xff] %v1313_v58  ;;  %1461 = vst [vmem:[#allocation5 + $0x18] sm:$0xff] %v1314_v8  ;;  %v3390_v4 = vmul.f32 %v1793_v57, %v3264_v30  ;;  %v3393_v6 = vmul.f32 %v1794_v24, %v3264_v30  ;;  %v1337_v55 = vadd.f32 %v1224_v21, %v3064_v10  ;;  %v3897_v57 = vld [vmem:[#allocation31_spill] sm:$0xff] }
 0x1c1   :  { %1462 = vst [vmem:[#allocation5 + $0x20] sm:$0xff] %v1315_v22  ;;  %1463 = vst [vmem:[#allocation5 + $0x28] sm:$0xff] %v1316_v33  ;;  %v1338_v11 = vadd.f32 %v1224_v21, %v3067_v45  ;;  %v1325_v20 = vadd.f32 %v1219_v47, %v3030_v35  ;;  %v1326_v5 = vadd.f32 %v1219_v47, %v3032_v12  ;;  %v1798_v22 = vld [vmem:[#allocation2 + $0x3f8] sm:$0xff] }
 0x1c2   :  { %1464 = vst.msk [vmem:[#allocation5 + $0x30] sm:$0xff] %vm181_vm0, %v1317_v39  ;;  %1479 = vst [vmem:[#allocation5 + $0xa8] sm:$0xff] %v1332_v16  ;;  %v1327_v51 = vadd.f32 %v1219_v47, %v3034_v25  ;;  %v1328_v36 = vadd.f32 %v1219_v47, %v3038_v28  ;;  %v1329_v9 = vadd.f32 %v1219_v47, %v3040_v46 }
 0x1c3   :  { %1480 = vst [vmem:[#allocation5 + $0xb0] sm:$0xff] %v1333_v41  ;;  %1481 = vst [vmem:[#allocation5 + $0xb8] sm:$0xff] %v1334_v7  ;;  %v1330_v10 = vadd.f32 %v1219_v47, %v3042_v54  ;;  %v1331_v45 = vadd.f32 %v1219_v47, %v3044_v13  ;;  %v1346_v35 = vadd.f32 %v1234_v23, %v3091_v34  ;;  %v1795_v54 = vld [vmem:[#allocation2 + $0x3e0] sm:$0xff]  ;;  %v1229_v34 = vpop.permute.xlu0 %1228  ;;  %v3895_v41 = vld [vmem:[#allocation12_spill] sm:$0xff] }
 0x1c4   :  { %1482 = vst [vmem:[#allocation5 + $0xc0] sm:$0xff] %v1335_v53  ;;  %1483 = vst [vmem:[#allocation5 + $0xc8] sm:$0xff] %v1336_v0  ;;  %v1347_v12 = vadd.f32 %v1234_v23, %v3094_v29  ;;  %v1348_v25 = vadd.f32 %v1234_v23, %v3099_v26  ;;  %v1349_v28 = vadd.f32 %v1234_v23, %v3102_v38  ;;  %v3896_v53 = vld [vmem:[#allocation13_spill] sm:$0xff]  ;;  %v3898_v47 = vld [vmem:[#allocation14_spill] sm:$0xff] }
 0x1c5   :  { %1484 = vst [vmem:[#allocation5 + $0xd0] sm:$0xff] %v1337_v55  ;;  %1485 = vst.msk [vmem:[#allocation5 + $0xd8] sm:$0xff] %vm181_vm0, %v1338_v11  ;;  %v1350_v46 = vadd.f32 %v1234_v23, %v3105_v62  ;;  %v3412_v13 = vmul.f32 %v1795_v54, %v3264_v30  ;;  %v3415_v15 = vmul.f32 %v1796_v1, %v3264_v30  ;;  %v1244_v30 = vpop.permute.xlu1 %1243  ;;  %v3906_v1 = vld [vmem:[#allocation10_spill] sm:$0xff] }
 0x1c6   :  { %1472 = vst [vmem:[#allocation5 + $0x70] sm:$0xff] %v1325_v20  ;;  %1473 = vst [vmem:[#allocation5 + $0x78] sm:$0xff] %v1326_v5  ;;  %v1351_v29 = vadd.f32 %v1234_v23, %v3108_v44  ;;  %v1352_v26 = vadd.f32 %v1234_v23, %v3113_v49  ;;  %v1339_v38 = vadd.f32 %v1229_v34, %v3070_v50  ;;  %v3899_v20 = vld [vmem:[#allocation33_spill] sm:$0xff]  ;;  %v3901_v23 = vld [vmem:[#allocation15_spill] sm:$0xff] }
 0x1c7   :  { %1474 = vst [vmem:[#allocation5 + $0x80] sm:$0xff] %v1327_v51  ;;  %1475 = vst [vmem:[#allocation5 + $0x88] sm:$0xff] %v1328_v36  ;;  %v1340_v62 = vadd.f32 %v1229_v34, %v3073_v56  ;;  %v1341_v18 = vadd.f32 %v1229_v34, %v3076_v2  ;;  %v1342_v3 = vadd.f32 %v1229_v34, %v3079_v63  ;;  %v3891_v63 = vld [vmem:[#allocation16_spill] sm:$0xff]  ;;  %v3900_v51 = vld [vmem:[#allocation34_spill] sm:$0xff] }
 0x1c8   :  { %1476 = vst [vmem:[#allocation5 + $0x90] sm:$0xff] %v1329_v9  ;;  %1477 = vst [vmem:[#allocation5 + $0x98] sm:$0xff] %v1330_v10  ;;  %v1343_v58 = vadd.f32 %v1229_v34, %v3082_v40  ;;  %v1344_v44 = vadd.f32 %v1229_v34, %v3085_v43  ;;  %v1345_v49 = vadd.f32 %v1229_v34, %v3088_v59  ;;  %v3892_v40 = vld [vmem:[#allocation36_spill] sm:$0xff] }
 0x1c9   :  { %1478 = vst.msk [vmem:[#allocation5 + $0xa0] sm:$0xff] %vm181_vm0, %v1331_v45  ;;  %1493 = vst [vmem:[#allocation5 + $0x118] sm:$0xff] %v1346_v35  ;;  %v1360_v50 = vadd.f32 %v1244_v30, %v3160_v61  ;;  %v1361_v56 = vadd.f32 %v1244_v30, %v3163_v42  ;;  %v1362_v2 = vadd.f32 %v1244_v30, %v3166_v14  ;;  %v1797_v43 = vld [vmem:[#allocation2 + $0x3f0] sm:$0xff]  ;;  %v1239_v61 = vpop.permute.xlu0 %1238  ;;  %v3893_v42 = vld [vmem:[#allocation18_spill] sm:$0xff]  ;;  %v1254_v11 = vpop.permute.xlu1 %1253 }
 0x1ca   :  { %1494 = vst [vmem:[#allocation5 + $0x120] sm:$0xff] %v1347_v12  ;;  %1495 = vst [vmem:[#allocation5 + $0x128] sm:$0xff] %v1348_v25  ;;  %v1363_v8 = vadd.f32 %v1244_v30, %v3891_v63  ;;  %v1364_v21 = vadd.f32 %v1244_v30, %v3892_v40  ;;  %v3434_v59 = vmul.f32 %v1797_v43, %v3250_v31  ;;  %v3894_v14 = vld [vmem:[#allocation19_spill] sm:$0xff]  ;;  %v3902_v10 = vld [vmem:[#allocation8_spill] sm:$0xff] }
 0x1cb   :  { %1496 = vst [vmem:[#allocation5 + $0x130] sm:$0xff] %v1349_v28  ;;  %1497 = vst [vmem:[#allocation5 + $0x138] sm:$0xff] %v1350_v46  ;;  %v3437_v33 = vmul.f32 %v1798_v22, %v3250_v31  ;;  %v1365_v39 = vadd.f32 %v1244_v30, %v3893_v42  ;;  %v1366_v16 = vadd.f32 %v1244_v30, %v3894_v14  ;;  %v3903_v35 = vld [vmem:[#allocation9_spill] sm:$0xff]  ;;  %v3905_v46 = vld [vmem:[#allocation22_spill] sm:$0xff] }
 0x1cc   :  { %1498 = vst [vmem:[#allocation5 + $0x140] sm:$0xff] %v1351_v29  ;;  %1499 = vst.msk [vmem:[#allocation5 + $0x148] sm:$0xff] %vm181_vm0, %v1352_v26  ;;  %v1353_v7 = vadd.f32 %v1239_v61, %v3895_v41  ;;  %v1354_v0 = vadd.f32 %v1239_v61, %v3896_v53  ;;  %v1355_v24 = vadd.f32 %v1239_v61, %v3897_v57  ;;  %v3904_v25 = vld [vmem:[#allocation29_spill] sm:$0xff]  ;;  %v1799_v29 = vld [vmem:[#allocation2 + $0x400] sm:$0xff] }
 0x1cd   :  { %1486 = vst [vmem:[#allocation5 + $0xe0] sm:$0xff] %v1339_v38  ;;  %1487 = vst [vmem:[#allocation5 + $0xe8] sm:$0xff] %v1340_v62  ;;  %v1356_v55 = vadd.f32 %v1239_v61, %v3898_v47  ;;  %v1357_v5 = vadd.f32 %v1239_v61, %v3899_v20  ;;  %v1358_v36 = vadd.f32 %v1239_v61, %v3900_v51  ;;  %v1800_v38 = vld [vmem:[#allocation2 + $0x408] sm:$0xff]  ;;  %v3912_v43 = vld [vmem:[#allocation24_spill] sm:$0xff] }
 0x1ce   :  { %1488 = vst [vmem:[#allocation5 + $0xf0] sm:$0xff] %v1341_v18  ;;  %1489 = vst [vmem:[#allocation5 + $0xf8] sm:$0xff] %v1342_v3  ;;  %v1359_v9 = vadd.f32 %v1239_v61, %v3901_v23  ;;  %v1374_v45 = vadd.f32 %v1254_v11, %v3902_v10  ;;  %v1375_v12 = vadd.f32 %v1254_v11, %v3903_v35  ;;  %v1249_v18 = vpop.permute.xlu0 %1248  ;;  %v3907_v3 = vld [vmem:[#allocation11_spill] sm:$0xff]  ;;  %v3913_v61 = vld [vmem:[#allocation25_spill] sm:$0xff] }
 0x1cf   :  { %1490 = vst [vmem:[#allocation5 + $0x100] sm:$0xff] %v1343_v58  ;;  %1491 = vst [vmem:[#allocation5 + $0x108] sm:$0xff] %v1344_v44  ;;  %v1376_v28 = vadd.f32 %v1254_v11, %v3904_v25  ;;  %v1377_v54 = vadd.f32 %v1254_v11, %v3905_v46  ;;  %v1378_v34 = vadd.f32 %v1254_v11, %v3906_v1  ;;  %v3908_v58 = vld [vmem:[#allocation27_spill] sm:$0xff]  ;;  %v3916_v41 = vld [vmem:[#allocation17_spill] sm:$0xff] }
 0x1d0   :  { %1492 = vst.msk [vmem:[#allocation5 + $0x110] sm:$0xff] %vm181_vm0, %v1345_v49  ;;  %1507 = vst [vmem:[#allocation5 + $0x188] sm:$0xff] %v1360_v50  ;;  %v3456_v26 = vmul.f32 %v1799_v29, %v3250_v31  ;;  %v3459_v62 = vmul.f32 %v1800_v38, %v3250_v31  ;;  %v1379_v30 = vadd.f32 %v1254_v11, %v3907_v3  ;;  %v3909_v50 = vld [vmem:[#allocation26_spill] sm:$0xff]  ;;  %v3917_v53 = vld [vmem:[#allocation20_spill] sm:$0xff] }
 0x1d1   :  { %1508 = vst [vmem:[#allocation5 + $0x190] sm:$0xff] %v1361_v56  ;;  %1509 = vst [vmem:[#allocation5 + $0x198] sm:$0xff] %v1362_v2  ;;  %v1380_v44 = vadd.f32 %v1254_v11, %v3908_v58  ;;  %v1367_v49 = vadd.f32 %v1249_v18, %v3206_v19  ;;  %v1368_v56 = vadd.f32 %v1249_v18, %v3909_v50  ;;  %v3910_v2 = vld [vmem:[#allocation48_spill] sm:$0xff]  ;;  %v3915_v19 = vld [vmem:[#allocation37_spill] sm:$0xff] }
 0x1d2   :  { %1510 = vst [vmem:[#allocation5 + $0x1a0] sm:$0xff] %v1363_v8  ;;  %1511 = vst [vmem:[#allocation5 + $0x1a8] sm:$0xff] %v1364_v21  ;;  %v1369_v63 = vadd.f32 %v1249_v18, %v3910_v2  ;;  %v3911_v8 = vld [vmem:[#allocation50_spill] sm:$0xff]  ;;  %v1264_v21 = vpop.permute.xlu1 %1263  ;;  %v1371_v22 = vadd.f32 %v1249_v18, %v3912_v43  ;;  %v1372_v42 = vadd.f32 %v1249_v18, %v3913_v61  ;;  %v3918_v57 = vld [vmem:[#allocation21_spill] sm:$0xff] }
 0x1d3   :  { %1512 = vst [vmem:[#allocation5 + $0x1b0] sm:$0xff] %v1365_v39  ;;  %1513 = vst.msk [vmem:[#allocation5 + $0x1b8] sm:$0xff] %vm181_vm0, %v1366_v16  ;;  %v1370_v40 = vadd.f32 %v1249_v18, %v3911_v8  ;;  %v3914_v39 = vld [vmem:[#allocation28_spill] sm:$0xff]  ;;  %v1388_v16 = vadd.f32 %v1264_v21, %v3915_v19  ;;  %v3919_v47 = vld [vmem:[#allocation43_spill] sm:$0xff] }
 0x1d4   :  { %1500 = vst [vmem:[#allocation5 + $0x150] sm:$0xff] %v1353_v7  ;;  %1501 = vst [vmem:[#allocation5 + $0x158] sm:$0xff] %v1354_v0  ;;  %v1373_v14 = vadd.f32 %v1249_v18, %v3914_v39  ;;  %v1389_v7 = vadd.f32 %v1264_v21, %v3916_v41  ;;  %v1390_v0 = vadd.f32 %v1264_v21, %v3917_v53  ;;  %v1801_v11 = vld [vmem:[#allocation2 + $0x410] sm:$0xff]  ;;  %v3920_v51 = vld [vmem:[#allocation46_spill] sm:$0xff] }
 0x1d5   :  { %1502 = vst [vmem:[#allocation5 + $0x160] sm:$0xff] %v1355_v24  ;;  %1503 = vst [vmem:[#allocation5 + $0x168] sm:$0xff] %v1356_v55  ;;  %v1391_v24 = vadd.f32 %v1264_v21, %v3918_v57  ;;  %v1392_v55 = vadd.f32 %v1264_v21, %v3919_v47  ;;  %v3478_v20 = vmul.f32 %v1801_v11, %v3250_v31  ;;  %v3921_v23 = vld [vmem:[#allocation23_spill] sm:$0xff]  ;;  %v3922_v35 = vld [vmem:[#allocation58_spill] sm:$0xff] }
 0x1d6   :  { %1504 = vst [vmem:[#allocation5 + $0x170] sm:$0xff] %v1357_v5  ;;  %1505 = vst [vmem:[#allocation5 + $0x178] sm:$0xff] %v1358_v36  ;;  %v1259_v5 = vpop.permute.xlu0 %1258  ;;  %v1393_v36 = vadd.f32 %v1264_v21, %v3920_v51  ;;  %v1802_v10 = vld [vmem:[#allocation2 + $0x428] sm:$0xff]  ;;  %v3923_v25 = vld [vmem:[#allocation30_spill] sm:$0xff]  ;;  %v1274_v29 = vpop.permute.xlu1 %1273 }
 0x1d7   :  { %1506 = vst.msk [vmem:[#allocation5 + $0x180] sm:$0xff] %vm181_vm0, %v1359_v9  ;;  %1521 = vst [vmem:[#allocation5 + $0x1f8] sm:$0xff] %v1374_v45  ;;  %v1394_v9 = vadd.f32 %v1264_v21, %v3921_v23  ;;  %v3484_v45 = vmul.f32 %v1802_v10, %v3328_v27  ;;  %v3924_v46 = vld [vmem:[#allocation55_spill] sm:$0xff]  ;;  %v3925_v1 = vld [vmem:[#allocation32_spill] sm:$0xff] }
 0x1d8   :  { %1522 = vst [vmem:[#allocation5 + $0x200] sm:$0xff] %v1375_v12  ;;  %1523 = vst [vmem:[#allocation5 + $0x208] sm:$0xff] %v1376_v28  ;;  %v1381_v12 = vadd.f32 %v1259_v5, %v3922_v35  ;;  %v1382_v28 = vadd.f32 %v1259_v5, %v3923_v25  ;;  %v3926_v38 = vld [vmem:[#allocation57_spill] sm:$0xff]  ;;  %v3927_v3 = vld [vmem:[#allocation35_spill] sm:$0xff] }
 0x1d9   :  { %1524 = vst [vmem:[#allocation5 + $0x210] sm:$0xff] %v1377_v54  ;;  %1525 = vst [vmem:[#allocation5 + $0x218] sm:$0xff] %v1378_v34  ;;  %v1383_v54 = vadd.f32 %v1259_v5, %v3924_v46  ;;  %v1384_v34 = vadd.f32 %v1259_v5, %v3925_v1  ;;  %v1385_v18 = vadd.f32 %v1259_v5, %v3926_v38  ;;  %v3928_v58 = vld [vmem:[#allocation41_spill] sm:$0xff]  ;;  %v3933_v43 = vld [vmem:[#allocation63_spill] sm:$0xff] }
 0x1da   :  { %1526 = vst [vmem:[#allocation5 + $0x220] sm:$0xff] %v1379_v30  ;;  %1527 = vst.msk [vmem:[#allocation5 + $0x228] sm:$0xff] %vm181_vm0, %v1380_v44  ;;  %v1386_v30 = vadd.f32 %v1259_v5, %v3927_v3  ;;  %v1387_v44 = vadd.f32 %v1259_v5, %v3928_v58  ;;  %v1269_v61 = vpop.permute.xlu0 %1268  ;;  %v1803_v19 = vld [vmem:[#allocation2 + $0x430] sm:$0xff]  ;;  %v1804_v41 = vld [vmem:[#allocation2 + $0x438] sm:$0xff] }
 0x1db   :  { %1514 = vst [vmem:[#allocation5 + $0x1c0] sm:$0xff] %v1367_v49  ;;  %1515 = vst [vmem:[#allocation5 + $0x1c8] sm:$0xff] %v1368_v56  ;;  %v3929_v49 = vld [vmem:[#allocation56_spill] sm:$0xff]  ;;  %v3930_v56 = vld [vmem:[#allocation65_spill] sm:$0xff]  ;;  %v1401_v10 = vadd.f32 %v1269_v61, %v3291_v37 }
 0x1dc   :  { %1516 = vst [vmem:[#allocation5 + $0x1d0] sm:$0xff] %v1369_v63  ;;  %1517 = vst [vmem:[#allocation5 + $0x1d8] sm:$0xff] %v1370_v40  ;;  %v1402_v50 = vadd.f32 %v1274_v29, %v3929_v49  ;;  %v1403_v2 = vadd.f32 %v1274_v29, %v3930_v56  ;;  %v3931_v63 = vld [vmem:[#allocation38_spill] sm:$0xff]  ;;  %v3932_v40 = vld [vmem:[#allocation39_spill] sm:$0xff] }
 0x1dd   :  { %1518 = vst [vmem:[#allocation5 + $0x1e0] sm:$0xff] %v1371_v22  ;;  %1519 = vst [vmem:[#allocation5 + $0x1e8] sm:$0xff] %v1372_v42  ;;  %v1404_v8 = vadd.f32 %v1274_v29, %v3931_v63  ;;  %v1405_v21 = vadd.f32 %v1274_v29, %v3932_v40  ;;  %v1406_v22 = vadd.f32 %v1274_v29, %v3933_v43  ;;  %v3934_v42 = vld [vmem:[#allocation40_spill] sm:$0xff]  ;;  %v3935_v53 = vld [vmem:[#allocation42_spill] sm:$0xff] }
 0x1de   :  { %1520 = vst.msk [vmem:[#allocation5 + $0x1f0] sm:$0xff] %vm181_vm0, %v1373_v14  ;;  %1535 = vst [vmem:[#allocation5 + $0x268] sm:$0xff] %v1388_v16  ;;  %v1407_v39 = vadd.f32 %v1274_v29, %v3934_v42  ;;  %v1408_v14 = vadd.f32 %v1274_v29, %v3270_v17  ;;  %v3503_v16 = vmul.f32 %v1803_v19, %v3328_v27  ;;  %v3936_v57 = vld [vmem:[#allocation67_spill] sm:$0xff]  ;;  %v3937_v47 = vld [vmem:[#allocation44_spill] sm:$0xff]  ;;  %v1284_v17 = vpop.permute.xlu1 %1283  ;;  %v1279_v37 = vpop.permute.xlu0 %1278 }
 0x1df   :  { %1536 = vst [vmem:[#allocation5 + $0x270] sm:$0xff] %v1389_v7  ;;  %1537 = vst [vmem:[#allocation5 + $0x278] sm:$0xff] %v1390_v0  ;;  %v3506_v7 = vmul.f32 %v1804_v41, %v3328_v27  ;;  %v1395_v0 = vadd.f32 %v1269_v61, %v3935_v53  ;;  %v3938_v11 = vld [vmem:[#allocation69_spill] sm:$0xff]  ;;  %v3939_v51 = vld [vmem:[#allocation47_spill] sm:$0xff] }
 0x1e0   :  { %1538 = vst [vmem:[#allocation5 + $0x280] sm:$0xff] %v1391_v24  ;;  %1539 = vst [vmem:[#allocation5 + $0x288] sm:$0xff] %v1392_v55  ;;  %v1396_v24 = vadd.f32 %v1269_v61, %v3936_v57  ;;  %v1397_v55 = vadd.f32 %v1269_v61, %v3937_v47  ;;  %v1398_v5 = vadd.f32 %v1269_v61, %v3938_v11  ;;  %v3940_v23 = vld [vmem:[#allocation45_spill] sm:$0xff]  ;;  %v3941_v35 = vld [vmem:[#allocation52_spill] sm:$0xff] }
 0x1e1   :  { %1540 = vst [vmem:[#allocation5 + $0x290] sm:$0xff] %v1393_v36  ;;  %1541 = vst.msk [vmem:[#allocation5 + $0x298] sm:$0xff] %vm181_vm0, %v1394_v9  ;;  %v1399_v36 = vadd.f32 %v1269_v61, %v3939_v51  ;;  %v1400_v9 = vadd.f32 %v1269_v61, %v3940_v23  ;;  %v3942_v25 = vld [vmem:[#allocation53_spill] sm:$0xff]  ;;  %v3943_v46 = vld [vmem:[#allocation79_spill] sm:$0xff] }
 0x1e2   :  { %1528 = vst [vmem:[#allocation5 + $0x230] sm:$0xff] %v1381_v12  ;;  %1529 = vst [vmem:[#allocation5 + $0x238] sm:$0xff] %v1382_v28  ;;  %v1416_v12 = vadd.f32 %v1284_v17, %v3941_v35  ;;  %v1417_v28 = vadd.f32 %v1284_v17, %v3942_v25  ;;  %v3944_v1 = vld [vmem:[#allocation54_spill] sm:$0xff]  ;;  %v1294_v42 = vpop.permute.xlu1 %1293  ;;  %v3954_v53 = vld [vmem:[#allocation81_spill] sm:$0xff] }
 0x1e3   :  { %1530 = vst [vmem:[#allocation5 + $0x240] sm:$0xff] %v1383_v54  ;;  %1531 = vst [vmem:[#allocation5 + $0x248] sm:$0xff] %v1384_v34  ;;  %v1418_v54 = vadd.f32 %v1284_v17, %v3943_v46  ;;  %v1419_v34 = vadd.f32 %v1284_v17, %v3944_v1  ;;  %v3945_v29 = vld [vmem:[#allocation62_spill] sm:$0xff]  ;;  %v1430_v57 = vadd.f32 %v1294_v42, %v3365_v60  ;;  %v1807_v51 = vld [vmem:[#allocation2 + $0x450] sm:$0xff] }
 0x1e4   :  { %1532 = vst [vmem:[#allocation5 + $0x250] sm:$0xff] %v1385_v18  ;;  %1533 = vst [vmem:[#allocation5 + $0x258] sm:$0xff] %v1386_v30  ;;  %v1420_v38 = vadd.f32 %v1284_v17, %v3945_v29  ;;  %v3946_v18 = vld [vmem:[#allocation60_spill] sm:$0xff]  ;;  %v3947_v30 = vld [vmem:[#allocation61_spill] sm:$0xff]  ;;  %v1432_v47 = vadd.f32 %v1294_v42, %v3371_v48  ;;  %v1434_v11 = vadd.f32 %v1294_v42, %v3393_v6 }
 0x1e5   :  { %1534 = vst.msk [vmem:[#allocation5 + $0x260] sm:$0xff] %vm181_vm0, %v1387_v44  ;;  %1549 = vst [vmem:[#allocation5 + $0x2d8] sm:$0xff] %v1402_v50  ;;  %v1421_v3 = vadd.f32 %v1284_v17, %v3946_v18  ;;  %v1422_v58 = vadd.f32 %v1284_v17, %v3947_v30  ;;  %v1805_v44 = vld [vmem:[#allocation2 + $0x440] sm:$0xff]  ;;  %v1806_v50 = vld [vmem:[#allocation2 + $0x448] sm:$0xff]  ;;  %v1435_v17 = vadd.f32 %v1294_v42, %v3412_v13 }
 0x1e6   :  { %1550 = vst [vmem:[#allocation5 + $0x2e0] sm:$0xff] %v1403_v2  ;;  %1551 = vst [vmem:[#allocation5 + $0x2e8] sm:$0xff] %v1404_v8  ;;  %v1195_v49 = vmul.f32 %v1805_v44, %v3328_v27  ;;  %v1196_v56 = vmul.f32 %v1806_v50, %v3328_v27  ;;  %v3948_v2 = vld [vmem:[#allocation71_spill] sm:$0xff]  ;;  %v3949_v8 = vld [vmem:[#allocation72_spill] sm:$0xff]  ;;  %v1436_v60 = vadd.f32 %v1294_v42, %v3415_v15  ;;  %v1304_v13 = vpop.permute.xlu1 %1303 }
 0x1e7   :  { %1552 = vst [vmem:[#allocation5 + $0x2f0] sm:$0xff] %v1405_v21  ;;  %1553 = vst [vmem:[#allocation5 + $0x2f8] sm:$0xff] %v1406_v22  ;;  %v1409_v63 = vadd.f32 %v1279_v37, %v3948_v2  ;;  %v1410_v40 = vadd.f32 %v1279_v37, %v3949_v8  ;;  %v3950_v21 = vld [vmem:[#allocation49_spill] sm:$0xff]  ;;  %v3951_v22 = vld [vmem:[#allocation59_spill] sm:$0xff]  ;;  %v1446_v29 = vadd.f32 %v1304_v13, %v3506_v7 }
 0x1e8   :  { %1554 = vst [vmem:[#allocation5 + $0x300] sm:$0xff] %v1407_v39  ;;  %1555 = vst.msk [vmem:[#allocation5 + $0x308] sm:$0xff] %vm181_vm0, %v1408_v14  ;;  %v1411_v43 = vadd.f32 %v1279_v37, %v3950_v21  ;;  %v1412_v61 = vadd.f32 %v1279_v37, %v3951_v22  ;;  %v3952_v39 = vld [vmem:[#allocation64_spill] sm:$0xff]  ;;  %v3953_v19 = vld [vmem:[#allocation66_spill] sm:$0xff] }
 0x1e9   :  { %1542 = vst [vmem:[#allocation5 + $0x2a0] sm:$0xff] %v1395_v0  ;;  %1543 = vst [vmem:[#allocation5 + $0x2a8] sm:$0xff] %v1396_v24  ;;  %v1413_v14 = vadd.f32 %v1279_v37, %v3952_v39  ;;  %v1414_v41 = vadd.f32 %v1279_v37, %v3953_v19  ;;  %v1415_v0 = vadd.f32 %v1279_v37, %v3954_v53  ;;  %v3955_v23 = vld [vmem:[#allocation68_spill] sm:$0xff]  ;;  %v3959_v15 = vld [vmem:[#allocation73_spill] sm:$0xff] }
 0x1ea   :  { %1544 = vst [vmem:[#allocation5 + $0x2b0] sm:$0xff] %v1397_v55  ;;  %1545 = vst [vmem:[#allocation5 + $0x2b8] sm:$0xff] %v1398_v5  ;;  %v1431_v24 = vadd.f32 %v1294_v42, %v3368_v52  ;;  %v1433_v55 = vadd.f32 %v1294_v42, %v3390_v4  ;;  %v1289_v5 = vpop.permute.xlu0 %1288  ;;  %v1808_v52 = vld [vmem:[#allocation2 + $0x458] sm:$0xff]  ;;  %v3960_v46 = vld [vmem:[#allocation74_spill] sm:$0xff]  ;;  %v1448_v37 = vadd.f32 %v1304_v13, %v1196_v56 }
 0x1eb   :  { %1546 = vst [vmem:[#allocation5 + $0x2c0] sm:$0xff] %v1399_v36  ;;  %1547 = vst [vmem:[#allocation5 + $0x2c8] sm:$0xff] %v1400_v9  ;;  %v1197_v36 = vmul.f32 %v1807_v51, %v3328_v27  ;;  %v1198_v48 = vmul.f32 %v1808_v52, %v3328_v27  ;;  %v1423_v4 = vadd.f32 %v1289_v5, %v3955_v23  ;;  %v3956_v9 = vld [vmem:[#allocation82_spill] sm:$0xff]  ;;  %v1809_v18 = vld [vmem:[#allocation2 + $0x418] sm:$0xff] }
 0x1ec   :  { %1548 = vst.msk [vmem:[#allocation5 + $0x2d0] sm:$0xff] %vm181_vm0, %v1401_v10  ;;  %1563 = vst [vmem:[#allocation5 + $0x348] sm:$0xff] %v1416_v12  ;;  %v1424_v6 = vadd.f32 %v1289_v5, %v3956_v9  ;;  %v3957_v10 = vld [vmem:[#allocation70_spill] sm:$0xff]  ;;  %v3958_v12 = vld [vmem:[#allocation76_spill] sm:$0xff]  ;;  %v1429_v1 = vadd.f32 %v1289_v5, %v3374_v32  ;;  %v1444_v27 = vadd.f32 %v1304_v13, %v3484_v45 }
 0x1ed   :  { %1564 = vst [vmem:[#allocation5 + $0x350] sm:$0xff] %v1417_v28  ;;  %1565 = vst [vmem:[#allocation5 + $0x358] sm:$0xff] %v1418_v54  ;;  %v1425_v35 = vadd.f32 %v1289_v5, %v3957_v10  ;;  %v1426_v25 = vadd.f32 %v1289_v5, %v3958_v12  ;;  %v1427_v28 = vadd.f32 %v1289_v5, %v3959_v15  ;;  %v1810_v30 = vld [vmem:[#allocation2 + $0x420] sm:$0xff]  ;;  %v1813_v8 = vld [vmem:[#allocation2 + $0x470] sm:$0xff] }
 0x1ee   :  { %1566 = vst [vmem:[#allocation5 + $0x360] sm:$0xff] %v1419_v34  ;;  %1567 = vst [vmem:[#allocation5 + $0x368] sm:$0xff] %v1420_v38  ;;  %v1428_v54 = vadd.f32 %v1289_v5, %v3960_v46  ;;  %v1445_v34 = vadd.f32 %v1304_v13, %v3503_v16  ;;  %v1447_v38 = vadd.f32 %v1304_v13, %v1195_v49  ;;  %v1299_v45 = vpop.permute.xlu0 %1298  ;;  %v1814_v21 = vld [vmem:[#allocation2 + $0x478] sm:$0xff]  ;;  %v1817_v39 = vld [vmem:[#allocation2 + $0x490] sm:$0xff] }
 0x1ef   :  { %1568 = vst [vmem:[#allocation5 + $0x370] sm:$0xff] %v1421_v3  ;;  %1569 = vst.msk [vmem:[#allocation5 + $0x378] sm:$0xff] %vm181_vm0, %v1422_v58  ;;  %v1190_v3 = vmul.f32 %v1809_v18, %v3250_v31  ;;  %v1191_v32 = vmul.f32 %v1810_v30, %v3250_v31  ;;  %v1449_v58 = vadd.f32 %v1304_v13, %v1197_v36 }
 0x1f0   :  { %1556 = vst [vmem:[#allocation5 + $0x310] sm:$0xff] %v1409_v63  ;;  %1557 = vst [vmem:[#allocation5 + $0x318] sm:$0xff] %v1410_v40  ;;  %v1450_v44 = vadd.f32 %v1304_v13, %v1198_v48  ;;  %v1437_v16 = vadd.f32 %v1299_v45, %v3434_v59  ;;  %v1438_v7 = vadd.f32 %v1299_v45, %v3437_v33  ;;  %v1811_v59 = vld [vmem:[#allocation2 + $0x460] sm:$0xff]  ;;  %v3961_v33 = vld [vmem:[#allocation51_spill] sm:$0xff] }
 0x1f1   :  { %1558 = vst [vmem:[#allocation5 + $0x320] sm:$0xff] %v1411_v43  ;;  %1559 = vst [vmem:[#allocation5 + $0x328] sm:$0xff] %v1412_v61  ;;  %v1439_v49 = vadd.f32 %v1299_v45, %v3456_v26  ;;  %v1440_v50 = vadd.f32 %v1299_v45, %v3459_v62  ;;  %v1441_v31 = vadd.f32 %v1299_v45, %v3478_v20  ;;  %v1812_v63 = vld [vmem:[#allocation2 + $0x468] sm:$0xff]  ;;  %v1815_v43 = vld [vmem:[#allocation2 + $0x480] sm:$0xff] }
 0x1f2   :  { %1560 = vst [vmem:[#allocation5 + $0x330] sm:$0xff] %v1413_v14  ;;  %1561 = vst [vmem:[#allocation5 + $0x338] sm:$0xff] %v1414_v41  ;;  %v1442_v56 = vadd.f32 %v1299_v45, %v1190_v3  ;;  %v1443_v2 = vadd.f32 %v1299_v45, %v1191_v32  ;;  %v1199_v26 = vmul.f32 %v1811_v59, %v3961_v33  ;;  %v1816_v61 = vld [vmem:[#allocation2 + $0x488] sm:$0xff]  ;;  %v1309_v19 = vpop.permute.xlu0 %1308 }
 0x1f3   :  { %1562 = vst.msk [vmem:[#allocation5 + $0x340] sm:$0xff] %vm181_vm0, %v1415_v0  ;;  %1577 = vst [vmem:[#allocation5 + $0x3b8] sm:$0xff] %v1430_v57  ;;  %v1200_v62 = vmul.f32 %v1812_v63, %v3961_v33  ;;  %v1201_v40 = vmul.f32 %v1813_v8, %v3961_v33  ;;  %v1202_v20 = vmul.f32 %v1814_v21, %v3961_v33 }
 0x1f4   :  { %1578 = vst [vmem:[#allocation5 + $0x3c0] sm:$0xff] %v1431_v24  ;;  %1579 = vst [vmem:[#allocation5 + $0x3c8] sm:$0xff] %v1432_v47  ;;  %v1203_v22 = vmul.f32 %v1815_v43, %v3961_v33  ;;  %v1204_v42 = vmul.f32 %v1816_v61, %v3961_v33  ;;  %v1205_v14 = vmul.f32 %v1817_v39, %v3961_v33 }
 0x1f5   :  { %1580 = vst [vmem:[#allocation5 + $0x3d0] sm:$0xff] %v1433_v55  ;;  %1581 = vst [vmem:[#allocation5 + $0x3d8] sm:$0xff] %v1434_v11  ;;  %v1451_v41 = vadd.f32 %v1309_v19, %v1199_v26  ;;  %v1452_v53 = vadd.f32 %v1309_v19, %v1200_v62  ;;  %v1453_v0 = vadd.f32 %v1309_v19, %v1201_v40 }
 0x1f6   :  { %1582 = vst [vmem:[#allocation5 + $0x3e0] sm:$0xff] %v1435_v17  ;;  %1583 = vst.msk [vmem:[#allocation5 + $0x3e8] sm:$0xff] %vm181_vm0, %v1436_v60  ;;  %v1454_v57 = vadd.f32 %v1309_v19, %v1202_v20  ;;  %v1455_v24 = vadd.f32 %v1309_v19, %v1203_v22  ;;  %v1456_v47 = vadd.f32 %v1309_v19, %v1204_v42 }
 0x1f7   :  { %1570 = vst [vmem:[#allocation5 + $0x380] sm:$0xff] %v1423_v4  ;;  %1571 = vst [vmem:[#allocation5 + $0x388] sm:$0xff] %v1424_v6  ;;  %v1457_v55 = vadd.f32 %v1309_v19, %v1205_v14 }
 0x1f8   :  { %1572 = vst [vmem:[#allocation5 + $0x390] sm:$0xff] %v1425_v35  ;;  %1573 = vst [vmem:[#allocation5 + $0x398] sm:$0xff] %v1426_v25 }
 0x1f9   :  { %1574 = vst [vmem:[#allocation5 + $0x3a0] sm:$0xff] %v1427_v28  ;;  %1575 = vst [vmem:[#allocation5 + $0x3a8] sm:$0xff] %v1428_v54 }
 0x1fa   :  { %1576 = vst.msk [vmem:[#allocation5 + $0x3b0] sm:$0xff] %vm181_vm0, %v1429_v1  ;;  %1591 = vst [vmem:[#allocation5 + $0x428] sm:$0xff] %v1444_v27 }
 0x1fb   :  { %1592 = vst [vmem:[#allocation5 + $0x430] sm:$0xff] %v1445_v34  ;;  %1593 = vst [vmem:[#allocation5 + $0x438] sm:$0xff] %v1446_v29 }
 0x1fc   :  { %1594 = vst [vmem:[#allocation5 + $0x440] sm:$0xff] %v1447_v38  ;;  %1595 = vst [vmem:[#allocation5 + $0x448] sm:$0xff] %v1448_v37 }
 0x1fd   :  { %1596 = vst [vmem:[#allocation5 + $0x450] sm:$0xff] %v1449_v58  ;;  %1597 = vst.msk [vmem:[#allocation5 + $0x458] sm:$0xff] %vm181_vm0, %v1450_v44 }
 0x1fe   :  { %1584 = vst [vmem:[#allocation5 + $0x3f0] sm:$0xff] %v1437_v16  ;;  %1585 = vst [vmem:[#allocation5 + $0x3f8] sm:$0xff] %v1438_v7 }
 0x1ff   :  { %1586 = vst [vmem:[#allocation5 + $0x400] sm:$0xff] %v1439_v49  ;;  %1587 = vst [vmem:[#allocation5 + $0x408] sm:$0xff] %v1440_v50 }
 0x200   :  { %1588 = vst [vmem:[#allocation5 + $0x410] sm:$0xff] %v1441_v31  ;;  %1589 = vst [vmem:[#allocation5 + $0x418] sm:$0xff] %v1442_v56 }
 0x201   :  { %1590 = vst.msk [vmem:[#allocation5 + $0x420] sm:$0xff] %vm181_vm0, %v1443_v2  ;;  %1598 = vst [vmem:[#allocation5 + $0x460] sm:$0xff] %v1451_v41 }
 0x202   :  { %1599 = vst [vmem:[#allocation5 + $0x468] sm:$0xff] %v1452_v53  ;;  %1600 = vst [vmem:[#allocation5 + $0x470] sm:$0xff] %v1453_v0 }
 0x203   :  { %1601 = vst [vmem:[#allocation5 + $0x478] sm:$0xff] %v1454_v57  ;;  %1602 = vst [vmem:[#allocation5 + $0x480] sm:$0xff] %v1455_v24 }
 0x204   :  { %1603 = vst [vmem:[#allocation5 + $0x488] sm:$0xff] %v1456_v47  ;;  %1604 = vst.msk [vmem:[#allocation5 + $0x490] sm:$0xff] %vm181_vm0, %v1457_v55 }
 0x205   :  { %1851 = shalt.err (!%p1848_p12)
}
 0x206   :  { %s1852_s6 = scalar_lea.hbm %s3591_s3, 18816 }
 0x207   :  { %p1853_p13 = scmp.ne.s32.totalorder %s3591_s3, %s1852_s6  ;;  %p1856_p0 = scmp.lt.u32.totalorder %s1852_s6, %s3591_s3 }
 0x209   :  { %p1858_p1 = pnand %p1856_p0, %p1853_p13 }
 0x20b   :  { %1861 = shalt.err (!%p1858_p1)
}
 0x20c   :  { %1616 = dma.vmem_to_hbm [thread:$0]  %s1611_s29, 18816, %s3591_s3, [#allocation4], %s1867_s22, %s1867_s22, %s1868_s23  }
 0x20d   :  { %1864 = dma.done.wait [#allocation4], 18816  }
 0x20e   :  { %1865 = vsyncadd [#allocation4], 4294948480 }
 0x20f   :  { %1620 = vsyncpa [#allocation3], 1 }
 0x210   :  { %1621 = vsyncpa [#allocation4], 1 }

</bundles_post_ra>
